<compile_context>
chip_gen: v5e
topology: v5e:2x2
jax: 0.10.0
libtpu: 0.0.40
codegen_flags: <defaults>
</compile_context>

<pallas_src>
import functools

import jax
import jax.numpy as jnp
from jax.experimental import pallas as pl
from jax.experimental.pallas import tpu as pltpu


_TILE_M = 256  # lane-dim tile of the output; multiple of 128.

_COMPILER_PARAMS = pltpu.CompilerParams(
    dimension_semantics=("parallel",),        # M tiles are independent
    vmem_limit_bytes=32 * 1024 * 1024,        # safe w.r.t. v7x 64 MiB VMEM
)


def _round_up(x, m):
    return (x + m - 1) // m * m


# ----------------------------- Pallas kernels -------------------------------


def _matmul_act_kernel(w_ref, p_ref, b_ref, o_ref, *, add_bias, relu_slope,
                       use_sigmoid):
    """y = W @ patches_T (+bias) (+LeakyReLU) (+Sigmoid), lane-dense on M."""
    # w_ref: [Cout_p, K_p] bf16 ; p_ref: [K_p, tile_m] bf16 ; out f32.
    y = jnp.dot(w_ref[...], p_ref[...], preferred_element_type=jnp.float32)
    if add_bias:
        y = y + b_ref[...]                      # [Cout_p, 1] lane-broadcast
    if relu_slope is not None:
        y = jnp.where(y >= 0, y, relu_slope * y)
    if use_sigmoid:
        y = jax.nn.sigmoid(y)
    o_ref[...] = y


def _scale_shift_act_kernel(y_ref, ss_ref, o_ref, *, relu_slope):
    """Per-channel affine (folded BatchNorm) + LeakyReLU."""
    y = y_ref[...]                              # [Cout_p, tile_m] f32
    ss = ss_ref[...]                            # [Cout_p, 2] (scale | shift)
    y = y * ss[:, 0:1] + ss[:, 1:2]
    if relu_slope is not None:
        y = jnp.where(y >= 0, y, relu_slope * y)
    o_ref[...] = y


# ------------------------------ JAX glue -------------------------------------


def _im2col_t(x_nchw, k, stride, pad):
    """Transposed patch matrix [Cin*k*k, N*OH*OW]; row order (c, kh, kw)
    matches PyTorch Conv2d weight.reshape(Cout, -1)."""
    N, C, H, W = x_nchw.shape
    xp = jnp.pad(x_nchw, ((0, 0), (0, 0), (pad, pad), (pad, pad)))
    OH = (H + 2 * pad - k) // stride + 1
    OW = (W + 2 * pad - k) // stride + 1
    cols = []
    for i in range(k):
        for j in range(k):
            cols.append(xp[:, :, i:i + stride * OH:stride,
                           j:j + stride * OW:stride])        # [N, C, OH, OW]
    col = jnp.stack(cols, axis=0).reshape(k, k, N, C, OH, OW)
    col = col.transpose(3, 0, 1, 2, 4, 5)                    # C, kh, kw, N, OH, OW
    return col.reshape(C * k * k, N * OH * OW), (N, OH, OW)


def conv_layer(x_nhwc, params, *, k, stride, pad, use_bn, relu_slope,
               use_sigmoid):
    w, b, gamma, beta = params                 # w: [Cout, Cin, k, k] f32
    cout = w.shape[0]

    # im2col in bf16 (halves HBM traffic of the inflated patch matrix).
    x_nchw = jnp.transpose(x_nhwc, (0, 3, 1, 2)).astype(jnp.bfloat16)
    patches_t, (N, OH, OW) = _im2col_t(x_nchw, k, stride, pad)   # [K, M]
    K, M = patches_t.shape

    # TPU-friendly padding: Cout -> x8 sublanes, K -> x128, M -> tile multiple.
    cout_p = _round_up(cout, 8)
    K_p = _round_up(K, 128)
    tile_m = min(_TILE_M, _round_up(M, 128))
    M_p = _round_up(M, tile_m)
    grid_t = M_p // tile_m

    patches_t = jnp.pad(patches_t, ((0, K_p - K), (0, M_p - M)))
    w_mat = jnp.pad(w.reshape(cout, K),
                    ((0, cout_p - cout), (0, K_p - K))).astype(jnp.bfloat16)
    bias = jnp.pad(b, (0, cout_p - cout)).reshape(cout_p, 1)

    mm_kernel = functools.partial(
        _matmul_act_kernel,
        add_bias=not use_bn,                   # BN cancels the conv bias
        relu_slope=None if use_bn else relu_slope,
        use_sigmoid=use_sigmoid)

    y = pl.pallas_call(
        mm_kernel,
        grid=(grid_t,),
        in_specs=[
            pl.BlockSpec((cout_p, K_p), lambda t: (0, 0)),   # weights resident
            pl.BlockSpec((K_p, tile_m), lambda t: (0, t)),   # patch tile
            pl.BlockSpec((cout_p, 1), lambda t: (0, 0)),     # bias
        ],
        out_specs=pl.BlockSpec((cout_p, tile_m), lambda t: (0, t)),
        out_shape=jax.ShapeDtypeStruct((cout_p, M_p), jnp.float32),
        compiler_params=_COMPILER_PARAMS,
    )(w_mat, patches_t, bias)

    if use_bn:
        # Training-mode BatchNorm: biased batch stats over the *full* valid
        # (N, OH, OW) extent (never per-tile), folded into scale/shift.
        y_valid = y[:cout, :M]
        mean = jnp.mean(y_valid, axis=1)
        var = jnp.mean(jnp.square(y_valid - mean[:, None]), axis=1)
        scale = gamma * jax.lax.rsqrt(var + 1e-5)
        shift = beta - mean * scale
        ss = jnp.pad(jnp.stack([scale, shift], axis=1),
                     ((0, cout_p - cout), (0, 0)))           # [Cout_p, 2]

        bn_kernel = functools.partial(_scale_shift_act_kernel,
                                      relu_slope=relu_slope)
        y = pl.pallas_call(
            bn_kernel,
            grid=(grid_t,),
            in_specs=[
                pl.BlockSpec((cout_p, tile_m), lambda t: (0, t)),
                pl.BlockSpec((cout_p, 2), lambda t: (0, 0)),
            ],
            out_specs=pl.BlockSpec((cout_p, tile_m), lambda t: (0, t)),
            out_shape=jax.ShapeDtypeStruct((cout_p, M_p), jnp.float32),
            compiler_params=_COMPILER_PARAMS,
        )(y, ss)

    out = y[:cout, :M].reshape(cout, N, OH, OW)
    return jnp.transpose(out, (1, 2, 3, 0))                  # NHWC


# ------------------------------ model ---------------------------------------


def init_params(key, channels_img, features_d):
    """Deterministic params; PyTorch Conv2d weight layout [Cout, Cin, kh, kw]."""
    layer_dims = [
        (features_d, channels_img),
        (features_d * 2, features_d),
        (features_d * 4, features_d * 2),
        (features_d * 6, features_d * 4),
        (1, features_d * 6),
    ]
    params = []
    for co, ci in layer_dims:
        key, kw, kb = jax.random.split(key, 3)
        fan_in = ci * 4 * 4
        bound = 1.0 / (fan_in ** 0.5)
        w = jax.random.uniform(kw, (co, ci, 4, 4), jnp.float32, -bound, bound)
        b = jax.random.uniform(kb, (co,), jnp.float32, -bound, bound)
        gamma = jnp.ones((co,), jnp.float32)    # BatchNorm default init
        beta = jnp.zeros((co,), jnp.float32)
        params.append((w, b, gamma, beta))
    return params


def discriminator_forward(x_nhwc, params):
    # disc1: conv(s=2), no norm, LeakyReLU(0.2)
    x = conv_layer(x_nhwc, params[0], k=4, stride=2, pad=1,
                   use_bn=False, relu_slope=0.2, use_sigmoid=False)
    # disc2: conv(s=2), BN, LeakyReLU(0.2)
    x = conv_layer(x, params[1], k=4, stride=2, pad=1,
                   use_bn=True, relu_slope=0.2, use_sigmoid=False)
    # disc3: conv(s=2), BN, LeakyReLU(0.2)
    x = conv_layer(x, params[2], k=4, stride=2, pad=1,
                   use_bn=True, relu_slope=0.2, use_sigmoid=False)
    # disc4: conv(s=1), BN, LeakyReLU(0.2)
    x = conv_layer(x, params[3], k=4, stride=1, pad=1,
                   use_bn=True, relu_slope=0.2, use_sigmoid=False)
    # disc5: conv(s=1), no norm, no relu, then Sigmoid (fused into the matmul)
    x = conv_layer(x, params[4], k=4, stride=1, pad=1,
                   use_bn=False, relu_slope=None, use_sigmoid=True)
    return x  # NHWC [N, OH, OW, 1]


if __name__ == "__main__":
    key = jax.random.PRNGKey(0)
    k_x, k_p = jax.random.split(key)

    N, H, W, C_IMG = 2, 32, 32, 3
    FEATURES_D = 8

    x = jax.random.normal(k_x, (N, H, W, C_IMG), jnp.float32)
    params = init_params(k_p, C_IMG, FEATURES_D)

    fwd = jax.jit(discriminator_forward)
    out = jax.block_until_ready(fwd(x, params))

    # spatial: 32 -> 16 -> 8 -> 4 -> 3 -> 2
    assert out.shape == (N, 2, 2, 1), out.shape
    assert bool(jnp.all(jnp.isfinite(out)))
    assert bool(jnp.all((out >= 0.0) & (out <= 1.0)))  # sigmoid range
    print("KERNEL_OK")
</pallas_src>

<mosaic_0001>
module attributes {stable_mosaic.version = 11 : i64} {
  func.func @_matmul_act_kernel(%arg0: i32, %arg1: memref<8x128xbf16, #tpu.memory_space<vmem>>, %arg2: memref<128x256xbf16, #tpu.memory_space<vmem>>, %arg3: memref<8x1xf32, #tpu.memory_space<vmem>>, %arg4: memref<8x256xf32, #tpu.memory_space<vmem>>) attributes {dimension_semantics = [#tpu.dimension_semantics<parallel>], iteration_bounds = array<i64: 2>, scalar_prefetch = 0 : i64, scratch_operands = 0 : i64, tpu.core_type = #tpu.core_type<tc>, window_params = [{pipeline_mode = #tpu.pipeline_mode<synchronous>, transform_indices = @transform_0, window_bounds = array<i64: 8, 128>}, {transform_indices = @transform_1, window_bounds = array<i64: 128, 256>}, {pipeline_mode = #tpu.pipeline_mode<synchronous>, transform_indices = @transform_2, window_bounds = array<i64: 8, 1>}, {transform_indices = @transform_3, window_bounds = array<i64: 8, 256>}]} {
    %c0 = arith.constant 0 : index
    %c0_0 = arith.constant 0 : index
    %0 = vector.load %arg1[%c0, %c0_0] : memref<8x128xbf16, #tpu.memory_space<vmem>>, vector<8x128xbf16>
    %c0_1 = arith.constant 0 : index
    %c0_2 = arith.constant 0 : index
    %1 = vector.load %arg2[%c0_1, %c0_2] : memref<128x256xbf16, #tpu.memory_space<vmem>>, vector<128x256xbf16>
    %cst = arith.constant dense<0.000000e+00> : vector<8x256xf32>
    %2 = tpu.matmul %0, %1, %cst {dimension_numbers = #tpu.dot_dimension_numbers<[1], [0], [0], [1], [0, 0, 1, 1], [], []>} : vector<8x128xbf16>, vector<128x256xbf16>, vector<8x256xf32> -> vector<8x256xf32>
    %c0_3 = arith.constant 0 : index
    %c0_4 = arith.constant 0 : index
    %3 = vector.load %arg3[%c0_3, %c0_4] : memref<8x1xf32, #tpu.memory_space<vmem>>, vector<8x1xf32>
    %4 = vector.broadcast %3 : vector<8x1xf32> to vector<8x256xf32>
    %5 = arith.addf %2, %4 : vector<8x256xf32>
    %cst_5 = arith.constant 0.000000e+00 : f32
    %6 = vector.broadcast %cst_5 : f32 to vector<8x256xf32>
    %7 = arith.cmpf oge, %5, %6 : vector<8x256xf32>
    %cst_6 = arith.constant 2.000000e-01 : f32
    %8 = vector.broadcast %cst_6 : f32 to vector<8x256xf32>
    %9 = arith.mulf %8, %5 : vector<8x256xf32>
    %10 = arith.select %7, %5, %9 : vector<8x256xi1>, vector<8x256xf32>
    %c0_7 = arith.constant 0 : index
    %c0_8 = arith.constant 0 : index
    %11 = vector.load %arg4[%c0_7, %c0_8] : memref<8x256xf32, #tpu.memory_space<vmem>>, vector<8x256xf32>
    tpu.vector_store %arg4[%c0_7, %c0_8], %10 {strides = array<i32>} : memref<8x256xf32, #tpu.memory_space<vmem>>, vector<8x256xf32>,
    return
  }
  func.func @transform_0(%arg0: i32) -> (i32, i32) {
    %c0_i32 = arith.constant 0 : i32
    %c0_i32_0 = arith.constant 0 : i32
    %c0_i32_1 = arith.constant 0 : i32
    return %c0_i32, %c0_i32_0 : i32, i32
  }
  func.func @transform_1(%arg0: i32) -> (i32, i32) {
    %c0_i32 = arith.constant 0 : i32
    %c0_i32_0 = arith.constant 0 : i32
    return %c0_i32, %arg0 : i32, i32
  }
  func.func @transform_2(%arg0: i32) -> (i32, i32) {
    %c0_i32 = arith.constant 0 : i32
    %c0_i32_0 = arith.constant 0 : i32
    %c0_i32_1 = arith.constant 0 : i32
    return %c0_i32, %c0_i32_0 : i32, i32
  }
  func.func @transform_3(%arg0: i32) -> (i32, i32) {
    %c0_i32 = arith.constant 0 : i32
    %c0_i32_0 = arith.constant 0 : i32
    return %c0_i32, %arg0 : i32, i32
  }
}

module attributes {stable_mosaic.version = 11 : i64} {
  func.func @_matmul_act_kernel(%arg0: i32, %arg1: memref<16x128xbf16, #tpu.memory_space<vmem>>, %arg2: memref<128x128xbf16, #tpu.memory_space<vmem>>, %arg3: memref<16x1xf32, #tpu.memory_space<vmem>>, %arg4: memref<16x128xf32, #tpu.memory_space<vmem>>) attributes {dimension_semantics = [#tpu.dimension_semantics<parallel>], iteration_bounds = array<i64: 1>, scalar_prefetch = 0 : i64, scratch_operands = 0 : i64, tpu.core_type = #tpu.core_type<tc>, window_params = [{pipeline_mode = #tpu.pipeline_mode<synchronous>, transform_indices = @transform_0, window_bounds = array<i64: 16, 128>}, {transform_indices = @transform_1, window_bounds = array<i64: 128, 128>}, {pipeline_mode = #tpu.pipeline_mode<synchronous>, transform_indices = @transform_2, window_bounds = array<i64: 16, 1>}, {transform_indices = @transform_3, window_bounds = array<i64: 16, 128>}]} {
    %c0 = arith.constant 0 : index
    %c0_0 = arith.constant 0 : index
    %0 = vector.load %arg1[%c0, %c0_0] : memref<16x128xbf16, #tpu.memory_space<vmem>>, vector<16x128xbf16>
    %c0_1 = arith.constant 0 : index
    %c0_2 = arith.constant 0 : index
    %1 = vector.load %arg2[%c0_1, %c0_2] : memref<128x128xbf16, #tpu.memory_space<vmem>>, vector<128x128xbf16>
    %cst = arith.constant dense<0.000000e+00> : vector<16x128xf32>
    %2 = tpu.matmul %0, %1, %cst {dimension_numbers = #tpu.dot_dimension_numbers<[1], [0], [0], [1], [0, 0, 1, 1], [], []>} : vector<16x128xbf16>, vector<128x128xbf16>, vector<16x128xf32> -> vector<16x128xf32>
    %c0_3 = arith.constant 0 : index
    %c0_4 = arith.constant 0 : index
    %3 = vector.load %arg4[%c0_3, %c0_4] : memref<16x128xf32, #tpu.memory_space<vmem>>, vector<16x128xf32>
    tpu.vector_store %arg4[%c0_3, %c0_4], %2 {strides = array<i32>} : memref<16x128xf32, #tpu.memory_space<vmem>>, vector<16x128xf32>,
    return
  }
  func.func @transform_0(%arg0: i32) -> (i32, i32) {
    %c0_i32 = arith.constant 0 : i32
    %c0_i32_0 = arith.constant 0 : i32
    %c0_i32_1 = arith.constant 0 : i32
    return %c0_i32, %c0_i32_0 : i32, i32
  }
  func.func @transform_1(%arg0: i32) -> (i32, i32) {
    %c0_i32 = arith.constant 0 : i32
    %c0_i32_0 = arith.constant 0 : i32
    return %c0_i32, %arg0 : i32, i32
  }
  func.func @transform_2(%arg0: i32) -> (i32, i32) {
    %c0_i32 = arith.constant 0 : i32
    %c0_i32_0 = arith.constant 0 : i32
    %c0_i32_1 = arith.constant 0 : i32
    return %c0_i32, %c0_i32_0 : i32, i32
  }
  func.func @transform_3(%arg0: i32) -> (i32, i32) {
    %c0_i32 = arith.constant 0 : i32
    %c0_i32_0 = arith.constant 0 : i32
    return %c0_i32, %arg0 : i32, i32
  }
}

module attributes {stable_mosaic.version = 11 : i64} {
  func.func @_scale_shift_act_kernel(%arg0: i32, %arg1: memref<16x128xf32, #tpu.memory_space<vmem>>, %arg2: memref<16x2xf32, #tpu.memory_space<vmem>>, %arg3: memref<16x128xf32, #tpu.memory_space<vmem>>) attributes {dimension_semantics = [#tpu.dimension_semantics<parallel>], iteration_bounds = array<i64: 1>, scalar_prefetch = 0 : i64, scratch_operands = 0 : i64, tpu.core_type = #tpu.core_type<tc>, window_params = [{transform_indices = @transform_0, window_bounds = array<i64: 16, 128>}, {pipeline_mode = #tpu.pipeline_mode<synchronous>, transform_indices = @transform_1, window_bounds = array<i64: 16, 2>}, {transform_indices = @transform_2, window_bounds = array<i64: 16, 128>}]} {
    %c0 = arith.constant 0 : index
    %c0_0 = arith.constant 0 : index
    %0 = vector.load %arg1[%c0, %c0_0] : memref<16x128xf32, #tpu.memory_space<vmem>>, vector<16x128xf32>
    %c0_1 = arith.constant 0 : index
    %c0_2 = arith.constant 0 : index
    %1 = vector.load %arg2[%c0_1, %c0_2] : memref<16x2xf32, #tpu.memory_space<vmem>>, vector<16x2xf32>
    %2 = vector.extract_strided_slice %1 {offsets = [0, 0], sizes = [16, 1], strides = [1, 1]} : vector<16x2xf32> to vector<16x1xf32>
    %3 = vector.broadcast %2 : vector<16x1xf32> to vector<16x128xf32>
    %4 = arith.mulf %0, %3 : vector<16x128xf32>
    %5 = vector.extract_strided_slice %1 {offsets = [0, 1], sizes = [16, 1], strides = [1, 1]} : vector<16x2xf32> to vector<16x1xf32>
    %6 = vector.broadcast %5 : vector<16x1xf32> to vector<16x128xf32>
    %7 = arith.addf %4, %6 : vector<16x128xf32>
    %cst = arith.constant 0.000000e+00 : f32
    %8 = vector.broadcast %cst : f32 to vector<16x128xf32>
    %9 = arith.cmpf oge, %7, %8 : vector<16x128xf32>
    %cst_3 = arith.constant 2.000000e-01 : f32
    %10 = vector.broadcast %cst_3 : f32 to vector<16x128xf32>
    %11 = arith.mulf %10, %7 : vector<16x128xf32>
    %12 = arith.select %9, %7, %11 : vector<16x128xi1>, vector<16x128xf32>
    %c0_4 = arith.constant 0 : index
    %c0_5 = arith.constant 0 : index
    %13 = vector.load %arg3[%c0_4, %c0_5] : memref<16x128xf32, #tpu.memory_space<vmem>>, vector<16x128xf32>
    tpu.vector_store %arg3[%c0_4, %c0_5], %12 {strides = array<i32>} : memref<16x128xf32, #tpu.memory_space<vmem>>, vector<16x128xf32>,
    return
  }
  func.func @transform_0(%arg0: i32) -> (i32, i32) {
    %c0_i32 = arith.constant 0 : i32
    %c0_i32_0 = arith.constant 0 : i32
    return %c0_i32, %arg0 : i32, i32
  }
  func.func @transform_1(%arg0: i32) -> (i32, i32) {
    %c0_i32 = arith.constant 0 : i32
    %c0_i32_0 = arith.constant 0 : i32
    %c0_i32_1 = arith.constant 0 : i32
    return %c0_i32, %c0_i32_0 : i32, i32
  }
  func.func @transform_2(%arg0: i32) -> (i32, i32) {
    %c0_i32 = arith.constant 0 : i32
    %c0_i32_0 = arith.constant 0 : i32
    return %c0_i32, %arg0 : i32, i32
  }
}

module attributes {stable_mosaic.version = 11 : i64} {
  func.func @_matmul_act_kernel(%arg0: i32, %arg1: memref<32x256xbf16, #tpu.memory_space<vmem>>, %arg2: memref<256x128xbf16, #tpu.memory_space<vmem>>, %arg3: memref<32x1xf32, #tpu.memory_space<vmem>>, %arg4: memref<32x128xf32, #tpu.memory_space<vmem>>) attributes {dimension_semantics = [#tpu.dimension_semantics<parallel>], iteration_bounds = array<i64: 1>, scalar_prefetch = 0 : i64, scratch_operands = 0 : i64, tpu.core_type = #tpu.core_type<tc>, window_params = [{pipeline_mode = #tpu.pipeline_mode<synchronous>, transform_indices = @transform_0, window_bounds = array<i64: 32, 256>}, {transform_indices = @transform_1, window_bounds = array<i64: 256, 128>}, {pipeline_mode = #tpu.pipeline_mode<synchronous>, transform_indices = @transform_2, window_bounds = array<i64: 32, 1>}, {transform_indices = @transform_3, window_bounds = array<i64: 32, 128>}]} {
    %c0 = arith.constant 0 : index
    %c0_0 = arith.constant 0 : index
    %0 = vector.load %arg1[%c0, %c0_0] : memref<32x256xbf16, #tpu.memory_space<vmem>>, vector<32x256xbf16>
    %c0_1 = arith.constant 0 : index
    %c0_2 = arith.constant 0 : index
    %1 = vector.load %arg2[%c0_1, %c0_2] : memref<256x128xbf16, #tpu.memory_space<vmem>>, vector<256x128xbf16>
    %cst = arith.constant dense<0.000000e+00> : vector<32x128xf32>
    %2 = tpu.matmul %0, %1, %cst {dimension_numbers = #tpu.dot_dimension_numbers<[1], [0], [0], [1], [0, 0, 1, 1], [], []>} : vector<32x256xbf16>, vector<256x128xbf16>, vector<32x128xf32> -> vector<32x128xf32>
    %c0_3 = arith.constant 0 : index
    %c0_4 = arith.constant 0 : index
    %3 = vector.load %arg4[%c0_3, %c0_4] : memref<32x128xf32, #tpu.memory_space<vmem>>, vector<32x128xf32>
    tpu.vector_store %arg4[%c0_3, %c0_4], %2 {strides = array<i32>} : memref<32x128xf32, #tpu.memory_space<vmem>>, vector<32x128xf32>,
    return
  }
  func.func @transform_0(%arg0: i32) -> (i32, i32) {
    %c0_i32 = arith.constant 0 : i32
    %c0_i32_0 = arith.constant 0 : i32
    %c0_i32_1 = arith.constant 0 : i32
    return %c0_i32, %c0_i32_0 : i32, i32
  }
  func.func @transform_1(%arg0: i32) -> (i32, i32) {
    %c0_i32 = arith.constant 0 : i32
    %c0_i32_0 = arith.constant 0 : i32
    return %c0_i32, %arg0 : i32, i32
  }
  func.func @transform_2(%arg0: i32) -> (i32, i32) {
    %c0_i32 = arith.constant 0 : i32
    %c0_i32_0 = arith.constant 0 : i32
    %c0_i32_1 = arith.constant 0 : i32
    return %c0_i32, %c0_i32_0 : i32, i32
  }
  func.func @transform_3(%arg0: i32) -> (i32, i32) {
    %c0_i32 = arith.constant 0 : i32
    %c0_i32_0 = arith.constant 0 : i32
    return %c0_i32, %arg0 : i32, i32
  }
}

module attributes {stable_mosaic.version = 11 : i64} {
  func.func @_scale_shift_act_kernel(%arg0: i32, %arg1: memref<32x128xf32, #tpu.memory_space<vmem>>, %arg2: memref<32x2xf32, #tpu.memory_space<vmem>>, %arg3: memref<32x128xf32, #tpu.memory_space<vmem>>) attributes {dimension_semantics = [#tpu.dimension_semantics<parallel>], iteration_bounds = array<i64: 1>, scalar_prefetch = 0 : i64, scratch_operands = 0 : i64, tpu.core_type = #tpu.core_type<tc>, window_params = [{transform_indices = @transform_0, window_bounds = array<i64: 32, 128>}, {pipeline_mode = #tpu.pipeline_mode<synchronous>, transform_indices = @transform_1, window_bounds = array<i64: 32, 2>}, {transform_indices = @transform_2, window_bounds = array<i64: 32, 128>}]} {
    %c0 = arith.constant 0 : index
    %c0_0 = arith.constant 0 : index
    %0 = vector.load %arg1[%c0, %c0_0] : memref<32x128xf32, #tpu.memory_space<vmem>>, vector<32x128xf32>
    %c0_1 = arith.constant 0 : index
    %c0_2 = arith.constant 0 : index
    %1 = vector.load %arg2[%c0_1, %c0_2] : memref<32x2xf32, #tpu.memory_space<vmem>>, vector<32x2xf32>
    %2 = vector.extract_strided_slice %1 {offsets = [0, 0], sizes = [32, 1], strides = [1, 1]} : vector<32x2xf32> to vector<32x1xf32>
    %3 = vector.broadcast %2 : vector<32x1xf32> to vector<32x128xf32>
    %4 = arith.mulf %0, %3 : vector<32x128xf32>
    %5 = vector.extract_strided_slice %1 {offsets = [0, 1], sizes = [32, 1], strides = [1, 1]} : vector<32x2xf32> to vector<32x1xf32>
    %6 = vector.broadcast %5 : vector<32x1xf32> to vector<32x128xf32>
    %7 = arith.addf %4, %6 : vector<32x128xf32>
    %cst = arith.constant 0.000000e+00 : f32
    %8 = vector.broadcast %cst : f32 to vector<32x128xf32>
    %9 = arith.cmpf oge, %7, %8 : vector<32x128xf32>
    %cst_3 = arith.constant 2.000000e-01 : f32
    %10 = vector.broadcast %cst_3 : f32 to vector<32x128xf32>
    %11 = arith.mulf %10, %7 : vector<32x128xf32>
    %12 = arith.select %9, %7, %11 : vector<32x128xi1>, vector<32x128xf32>
    %c0_4 = arith.constant 0 : index
    %c0_5 = arith.constant 0 : index
    %13 = vector.load %arg3[%c0_4, %c0_5] : memref<32x128xf32, #tpu.memory_space<vmem>>, vector<32x128xf32>
    tpu.vector_store %arg3[%c0_4, %c0_5], %12 {strides = array<i32>} : memref<32x128xf32, #tpu.memory_space<vmem>>, vector<32x128xf32>,
    return
  }
  func.func @transform_0(%arg0: i32) -> (i32, i32) {
    %c0_i32 = arith.constant 0 : i32
    %c0_i32_0 = arith.constant 0 : i32
    return %c0_i32, %arg0 : i32, i32
  }
  func.func @transform_1(%arg0: i32) -> (i32, i32) {
    %c0_i32 = arith.constant 0 : i32
    %c0_i32_0 = arith.constant 0 : i32
    %c0_i32_1 = arith.constant 0 : i32
    return %c0_i32, %c0_i32_0 : i32, i32
  }
  func.func @transform_2(%arg0: i32) -> (i32, i32) {
    %c0_i32 = arith.constant 0 : i32
    %c0_i32_0 = arith.constant 0 : i32
    return %c0_i32, %arg0 : i32, i32
  }
}

module attributes {stable_mosaic.version = 11 : i64} {
  func.func @_matmul_act_kernel(%arg0: i32, %arg1: memref<48x512xbf16, #tpu.memory_space<vmem>>, %arg2: memref<512x128xbf16, #tpu.memory_space<vmem>>, %arg3: memref<48x1xf32, #tpu.memory_space<vmem>>, %arg4: memref<48x128xf32, #tpu.memory_space<vmem>>) attributes {dimension_semantics = [#tpu.dimension_semantics<parallel>], iteration_bounds = array<i64: 1>, scalar_prefetch = 0 : i64, scratch_operands = 0 : i64, tpu.core_type = #tpu.core_type<tc>, window_params = [{pipeline_mode = #tpu.pipeline_mode<synchronous>, transform_indices = @transform_0, window_bounds = array<i64: 48, 512>}, {transform_indices = @transform_1, window_bounds = array<i64: 512, 128>}, {pipeline_mode = #tpu.pipeline_mode<synchronous>, transform_indices = @transform_2, window_bounds = array<i64: 48, 1>}, {transform_indices = @transform_3, window_bounds = array<i64: 48, 128>}]} {
    %c0 = arith.constant 0 : index
    %c0_0 = arith.constant 0 : index
    %0 = vector.load %arg1[%c0, %c0_0] : memref<48x512xbf16, #tpu.memory_space<vmem>>, vector<48x512xbf16>
    %c0_1 = arith.constant 0 : index
    %c0_2 = arith.constant 0 : index
    %1 = vector.load %arg2[%c0_1, %c0_2] : memref<512x128xbf16, #tpu.memory_space<vmem>>, vector<512x128xbf16>
    %cst = arith.constant dense<0.000000e+00> : vector<48x128xf32>
    %2 = tpu.matmul %0, %1, %cst {dimension_numbers = #tpu.dot_dimension_numbers<[1], [0], [0], [1], [0, 0, 1, 1], [], []>} : vector<48x512xbf16>, vector<512x128xbf16>, vector<48x128xf32> -> vector<48x128xf32>
    %c0_3 = arith.constant 0 : index
    %c0_4 = arith.constant 0 : index
    %3 = vector.load %arg4[%c0_3, %c0_4] : memref<48x128xf32, #tpu.memory_space<vmem>>, vector<48x128xf32>
    tpu.vector_store %arg4[%c0_3, %c0_4], %2 {strides = array<i32>} : memref<48x128xf32, #tpu.memory_space<vmem>>, vector<48x128xf32>,
    return
  }
  func.func @transform_0(%arg0: i32) -> (i32, i32) {
    %c0_i32 = arith.constant 0 : i32
    %c0_i32_0 = arith.constant 0 : i32
    %c0_i32_1 = arith.constant 0 : i32
    return %c0_i32, %c0_i32_0 : i32, i32
  }
  func.func @transform_1(%arg0: i32) -> (i32, i32) {
    %c0_i32 = arith.constant 0 : i32
    %c0_i32_0 = arith.constant 0 : i32
    return %c0_i32, %arg0 : i32, i32
  }
  func.func @transform_2(%arg0: i32) -> (i32, i32) {
    %c0_i32 = arith.constant 0 : i32
    %c0_i32_0 = arith.constant 0 : i32
    %c0_i32_1 = arith.constant 0 : i32
    return %c0_i32, %c0_i32_0 : i32, i32
  }
  func.func @transform_3(%arg0: i32) -> (i32, i32) {
    %c0_i32 = arith.constant 0 : i32
    %c0_i32_0 = arith.constant 0 : i32
    return %c0_i32, %arg0 : i32, i32
  }
}

module attributes {stable_mosaic.version = 11 : i64} {
  func.func @_scale_shift_act_kernel(%arg0: i32, %arg1: memref<48x128xf32, #tpu.memory_space<vmem>>, %arg2: memref<48x2xf32, #tpu.memory_space<vmem>>, %arg3: memref<48x128xf32, #tpu.memory_space<vmem>>) attributes {dimension_semantics = [#tpu.dimension_semantics<parallel>], iteration_bounds = array<i64: 1>, scalar_prefetch = 0 : i64, scratch_operands = 0 : i64, tpu.core_type = #tpu.core_type<tc>, window_params = [{transform_indices = @transform_0, window_bounds = array<i64: 48, 128>}, {pipeline_mode = #tpu.pipeline_mode<synchronous>, transform_indices = @transform_1, window_bounds = array<i64: 48, 2>}, {transform_indices = @transform_2, window_bounds = array<i64: 48, 128>}]} {
    %c0 = arith.constant 0 : index
    %c0_0 = arith.constant 0 : index
    %0 = vector.load %arg1[%c0, %c0_0] : memref<48x128xf32, #tpu.memory_space<vmem>>, vector<48x128xf32>
    %c0_1 = arith.constant 0 : index
    %c0_2 = arith.constant 0 : index
    %1 = vector.load %arg2[%c0_1, %c0_2] : memref<48x2xf32, #tpu.memory_space<vmem>>, vector<48x2xf32>
    %2 = vector.extract_strided_slice %1 {offsets = [0, 0], sizes = [48, 1], strides = [1, 1]} : vector<48x2xf32> to vector<48x1xf32>
    %3 = vector.broadcast %2 : vector<48x1xf32> to vector<48x128xf32>
    %4 = arith.mulf %0, %3 : vector<48x128xf32>
    %5 = vector.extract_strided_slice %1 {offsets = [0, 1], sizes = [48, 1], strides = [1, 1]} : vector<48x2xf32> to vector<48x1xf32>
    %6 = vector.broadcast %5 : vector<48x1xf32> to vector<48x128xf32>
    %7 = arith.addf %4, %6 : vector<48x128xf32>
    %cst = arith.constant 0.000000e+00 : f32
    %8 = vector.broadcast %cst : f32 to vector<48x128xf32>
    %9 = arith.cmpf oge, %7, %8 : vector<48x128xf32>
    %cst_3 = arith.constant 2.000000e-01 : f32
    %10 = vector.broadcast %cst_3 : f32 to vector<48x128xf32>
    %11 = arith.mulf %10, %7 : vector<48x128xf32>
    %12 = arith.select %9, %7, %11 : vector<48x128xi1>, vector<48x128xf32>
    %c0_4 = arith.constant 0 : index
    %c0_5 = arith.constant 0 : index
    %13 = vector.load %arg3[%c0_4, %c0_5] : memref<48x128xf32, #tpu.memory_space<vmem>>, vector<48x128xf32>
    tpu.vector_store %arg3[%c0_4, %c0_5], %12 {strides = array<i32>} : memref<48x128xf32, #tpu.memory_space<vmem>>, vector<48x128xf32>,
    return
  }
  func.func @transform_0(%arg0: i32) -> (i32, i32) {
    %c0_i32 = arith.constant 0 : i32
    %c0_i32_0 = arith.constant 0 : i32
    return %c0_i32, %arg0 : i32, i32
  }
  func.func @transform_1(%arg0: i32) -> (i32, i32) {
    %c0_i32 = arith.constant 0 : i32
    %c0_i32_0 = arith.constant 0 : i32
    %c0_i32_1 = arith.constant 0 : i32
    return %c0_i32, %c0_i32_0 : i32, i32
  }
  func.func @transform_2(%arg0: i32) -> (i32, i32) {
    %c0_i32 = arith.constant 0 : i32
    %c0_i32_0 = arith.constant 0 : i32
    return %c0_i32, %arg0 : i32, i32
  }
}

module attributes {stable_mosaic.version = 11 : i64} {
  func.func @_matmul_act_kernel(%arg0: i32, %arg1: memref<8x768xbf16, #tpu.memory_space<vmem>>, %arg2: memref<768x128xbf16, #tpu.memory_space<vmem>>, %arg3: memref<8x1xf32, #tpu.memory_space<vmem>>, %arg4: memref<8x128xf32, #tpu.memory_space<vmem>>) attributes {dimension_semantics = [#tpu.dimension_semantics<parallel>], iteration_bounds = array<i64: 1>, scalar_prefetch = 0 : i64, scratch_operands = 0 : i64, tpu.core_type = #tpu.core_type<tc>, window_params = [{pipeline_mode = #tpu.pipeline_mode<synchronous>, transform_indices = @transform_0, window_bounds = array<i64: 8, 768>}, {transform_indices = @transform_1, window_bounds = array<i64: 768, 128>}, {pipeline_mode = #tpu.pipeline_mode<synchronous>, transform_indices = @transform_2, window_bounds = array<i64: 8, 1>}, {transform_indices = @transform_3, window_bounds = array<i64: 8, 128>}]} {
    %c0 = arith.constant 0 : index
    %c0_0 = arith.constant 0 : index
    %0 = vector.load %arg1[%c0, %c0_0] : memref<8x768xbf16, #tpu.memory_space<vmem>>, vector<8x768xbf16>
    %c0_1 = arith.constant 0 : index
    %c0_2 = arith.constant 0 : index
    %1 = vector.load %arg2[%c0_1, %c0_2] : memref<768x128xbf16, #tpu.memory_space<vmem>>, vector<768x128xbf16>
    %cst = arith.constant dense<0.000000e+00> : vector<8x128xf32>
    %2 = tpu.matmul %0, %1, %cst {dimension_numbers = #tpu.dot_dimension_numbers<[1], [0], [0], [1], [0, 0, 1, 1], [], []>} : vector<8x768xbf16>, vector<768x128xbf16>, vector<8x128xf32> -> vector<8x128xf32>
    %c0_3 = arith.constant 0 : index
    %c0_4 = arith.constant 0 : index
    %3 = vector.load %arg3[%c0_3, %c0_4] : memref<8x1xf32, #tpu.memory_space<vmem>>, vector<8x1xf32>
    %4 = vector.broadcast %3 : vector<8x1xf32> to vector<8x128xf32>
    %5 = arith.addf %2, %4 : vector<8x128xf32>
    %6 = arith.negf %5 : vector<8x128xf32>
    %7 = math.exp %6 : vector<8x128xf32>
    %cst_5 = arith.constant 1.000000e+00 : f32
    %8 = vector.broadcast %cst_5 : f32 to vector<8x128xf32>
    %9 = arith.addf %8, %7 : vector<8x128xf32>
    %10 = arith.divf %8, %9 : vector<8x128xf32>
    %c0_6 = arith.constant 0 : index
    %c0_7 = arith.constant 0 : index
    %11 = vector.load %arg4[%c0_6, %c0_7] : memref<8x128xf32, #tpu.memory_space<vmem>>, vector<8x128xf32>
    tpu.vector_store %arg4[%c0_6, %c0_7], %10 {strides = array<i32>} : memref<8x128xf32, #tpu.memory_space<vmem>>, vector<8x128xf32>,
    return
  }
  func.func @transform_0(%arg0: i32) -> (i32, i32) {
    %c0_i32 = arith.constant 0 : i32
    %c0_i32_0 = arith.constant 0 : i32
    %c0_i32_1 = arith.constant 0 : i32
    return %c0_i32, %c0_i32_0 : i32, i32
  }
  func.func @transform_1(%arg0: i32) -> (i32, i32) {
    %c0_i32 = arith.constant 0 : i32
    %c0_i32_0 = arith.constant 0 : i32
    return %c0_i32, %arg0 : i32, i32
  }
  func.func @transform_2(%arg0: i32) -> (i32, i32) {
    %c0_i32 = arith.constant 0 : i32
    %c0_i32_0 = arith.constant 0 : i32
    %c0_i32_1 = arith.constant 0 : i32
    return %c0_i32, %c0_i32_0 : i32, i32
  }
  func.func @transform_3(%arg0: i32) -> (i32, i32) {
    %c0_i32 = arith.constant 0 : i32
    %c0_i32_0 = arith.constant 0 : i32
    return %c0_i32, %arg0 : i32, i32
  }
}

</mosaic_0001>

<bundles_post_ra>
// kernel: discriminator_forward.8
= control target key start
LH: loop header
LB: loop body
LE: loop exit
PB: predicated region body
PF: predicated region fallthrough
CT: control target
= control target key end

     0   :  { %s633_s12 = smov 0   ;;  %s635_s13 = smov 0   ;;  %s743_s0 = inlined_call_operand.vmem [shape: bf16[8,128], index: 0, kind: input, shape index: {}]   ;;  %s744_s1 = inlined_call_operand.vmem [shape: bf16[128,512], index: 1, kind: input, shape index: {}]   ;;  %s745_s2 = inlined_call_operand.vmem [shape: f32[8,1], index: 2, kind: input, shape index: {}]   ;;  %s746_s3 = inlined_call_operand.vmem [shape: f32[8,512], index: 3, kind: output, shape index: {}]  }
   0x1   :  { %s637_s14 = smov 0  }
   0x2 LB: > { %s468_s15 = sadd.s32 4294967295, %s610_s14   ;;  %s650_s16 = sadd.s32 1, %s610_s14   ;;  %s610_s14 = sphi %s637_s14, %s749_s14   ;;  %s606_s13 = sphi %s635_s13, %s748_s13   ;;  %s602_s12 = sphi %s633_s12, %s747_s12  }
   0x3   : > { %s38_s17 = ssub.s32 %s610_s14, %s650_s16  ;;  %s41_s18 = sadd.s32 1, %s606_s13 }
   0x4   : > { %p39_p0 = scmp.eq.s32.totalorder %s38_s17, 0  ;;  %p48_p1 = scmp.ne.s32.totalorder %s606_s13, %s602_s12 }
   0x5   : > { %p49_p2 = scmp.eq.s32.totalorder %s610_s14, 0  ;;  %p471_p4 = scmp.ge.s32.totalorder %s610_s14, 2 }
   0x6   : > { %s659_s19 = scalar_select %p39_p0, %s606_s13, %s41_s18  }
   0x7   : > { %p50_p3 = por %p49_p2, %p48_p1  ;;  %127 = sbr.rel (%p471_p4) target bundleno = 32 (0x20), region = 24 }
   0xc   : > { %130 = sbr.rel (!%p50_p3) target bundleno = 32 (0x20), region = 28  ;;  %s132_s20 = sand.u32 (%p50_p3), 1, %s606_s13  }
   0xd   : > { %s545_s21 = sshll.u32 (%p50_p3), %s610_s14, 3  ;;  %s472_s22 = sshll.u32 (%p50_p3), %s132_s20, 7 }
   0xe   : > { %s667_s25 = scalar_lea.vmem (%p50_p3), %s744_s1, %s545_s21  ;;  %s134_s26 = scalar_lea.vmem (%p50_p3), [#allocation2], %s472_s22 }
   0xf   : > { %v196_v0 = vld [vmem:[%s667_s25] sm:$0xff] (%p50_p3)  ;;  %v198_v1 = vld [vmem:[%s667_s25 + $0x10] sm:$0xff] (%p50_p3) }
  0x10   : > { %v200_v2 = vld [vmem:[%s667_s25 + $0x20] sm:$0xff] (%p50_p3)  ;;  %197 = vst [vmem:[%s134_s26] sm:$0xff] (%p50_p3), %v196_v0  ;;  %v202_v3 = vld [vmem:[%s667_s25 + $0x30] sm:$0xff] (%p50_p3) }
  0x11   : > { %199 = vst [vmem:[%s134_s26 + $0x8] sm:$0xff] %v198_v1  ;;  %v204_v4 = vld [vmem:[%s667_s25 + $0x40] sm:$0xff]  ;;  %v206_v5 = vld [vmem:[%s667_s25 + $0x50] sm:$0xff] }
  0x12   : > { %201 = vst [vmem:[%s134_s26 + $0x10] sm:$0xff] %v200_v2  ;;  %v208_v6 = vld [vmem:[%s667_s25 + $0x60] sm:$0xff]  ;;  %v210_v7 = vld [vmem:[%s667_s25 + $0x70] sm:$0xff] }
  0x13   : > { %203 = vst [vmem:[%s134_s26 + $0x18] sm:$0xff] %v202_v3  ;;  %v212_v8 = vld [vmem:[%s667_s25 + $0x80] sm:$0xff]  ;;  %v214_v9 = vld [vmem:[%s667_s25 + $0x90] sm:$0xff] }
  0x14   : > { %205 = vst [vmem:[%s134_s26 + $0x20] sm:$0xff] %v204_v4  ;;  %v216_v10 = vld [vmem:[%s667_s25 + $0xa0] sm:$0xff]  ;;  %v218_v11 = vld [vmem:[%s667_s25 + $0xb0] sm:$0xff] }
  0x15   : > { %207 = vst [vmem:[%s134_s26 + $0x28] sm:$0xff] %v206_v5  ;;  %v220_v12 = vld [vmem:[%s667_s25 + $0xc0] sm:$0xff]  ;;  %v222_v13 = vld [vmem:[%s667_s25 + $0xd0] sm:$0xff] }
  0x16   : > { %209 = vst [vmem:[%s134_s26 + $0x30] sm:$0xff] %v208_v6  ;;  %v224_v14 = vld [vmem:[%s667_s25 + $0xe0] sm:$0xff]  ;;  %v226_v15 = vld [vmem:[%s667_s25 + $0xf0] sm:$0xff] }
  0x17   : > { %211 = vst [vmem:[%s134_s26 + $0x38] sm:$0xff] %v210_v7 }
  0x18   : > { %213 = vst [vmem:[%s134_s26 + $0x40] sm:$0xff] %v212_v8 }
  0x19   : > { %215 = vst [vmem:[%s134_s26 + $0x48] sm:$0xff] %v214_v9 }
  0x1a   : > { %217 = vst [vmem:[%s134_s26 + $0x50] sm:$0xff] %v216_v10 }
  0x1b   : > { %219 = vst [vmem:[%s134_s26 + $0x58] sm:$0xff] %v218_v11 }
  0x1c   : > { %221 = vst [vmem:[%s134_s26 + $0x60] sm:$0xff] %v220_v12 }
  0x1d   : > { %223 = vst [vmem:[%s134_s26 + $0x68] sm:$0xff] %v222_v13 }
  0x1e   : > { %225 = vst [vmem:[%s134_s26 + $0x70] sm:$0xff] %v224_v14 }
  0x1f   : > { %227 = vst [vmem:[%s134_s26 + $0x78] sm:$0xff] %v226_v15 }
  0x20 PF: > { %p475_p5 = scmp.ge.s32.totalorder %s610_s14, 1  ;;  %p232_p6 = scmp.lt.s32.totalorder %s610_s14, 3 }
  0x22   : > { %p233_p7 = pnand %p475_p5, %p232_p6 }
  0x23   : > { %s239_s27 = sand.u32 (!%p233_p7), 1, %s602_s12   ;;  %s477_s7 = sshll.u32 (!%p233_p7), %s468_s15, 1 }
  0x24   : > { %236 = sbr.rel (%p233_p7) target bundleno = 210 (0xd2), region = 66  ;;  %s476_s28 = sshll.u32 (!%p233_p7), %s239_s27, 7 }
  0x25   : > { %s688_s29 = scalar_lea.vmem (!%p233_p7), [#allocation2], %s476_s28  ;;  %p264_p8 = scmp.lt.s32.totalorder (!%p233_p7), %s477_s7, 3 }
  0x29   : > { %v537_v16 = vld [vmem:[%s688_s29 + $0x70] sm:$0xf]  ;;  %v561_v17 = vld [vmem:[%s688_s29 + $0x74] sm:$0xf0]  ;;  %v560_v18 = vld [vmem:[%s688_s29 + $0x74] sm:$0xf] }
  0x2a   : > { %v538_v19 = vor.u32 %v561_v17, %v537_v16  ;;  %v539_v20 = vld [vmem:[%s688_s29 + $0x78] sm:$0xf0]  ;;  %v529_v21 = vld [vmem:[%s688_s29 + $0x60] sm:$0xf]  ;;  %v559_v22 = vld [vmem:[%s688_s29 + $0x64] sm:$0xf0] }
  0x2b   : > { %v542_v23 = vor.u32 %v560_v18, %v539_v20  ;;  %v558_v24 = vld [vmem:[%s688_s29 + $0x64] sm:$0xf]  ;;  %v531_v25 = vld [vmem:[%s688_s29 + $0x68] sm:$0xf0]  ;;  %v530_v26 = vor.u32 %v559_v22, %v529_v21  ;;  %v521_v28 = vld [vmem:[%s688_s29 + $0x50] sm:$0xf] }
  0x2c   : > { %372 = vmatpush.bf16.msra.mxu0 %v538_v19  ;;  %v534_v27 = vor.u32 %v558_v24, %v531_v25  ;;  %v557_v29 = vld [vmem:[%s688_s29 + $0x54] sm:$0xf0]  ;;  %v556_v30 = vld [vmem:[%s688_s29 + $0x54] sm:$0xf]  ;;  %v523_v31 = vld [vmem:[%s688_s29 + $0x58] sm:$0xf0] }
  0x2d   : > { %385 = vmatpush.bf16.msra.mxu1 %v542_v23  ;;  %v522_v32 = vor.u32 %v557_v29, %v521_v28  ;;  %v526_v33 = vor.u32 %v556_v30, %v523_v31  ;;  %v513_v34 = vld [vmem:[%s688_s29 + $0x40] sm:$0xf]  ;;  %v555_v35 = vld [vmem:[%s688_s29 + $0x44] sm:$0xf0]  ;;  %v554_v36 = vld [vmem:[%s688_s29 + $0x44] sm:$0xf] }
  0x2e   : > { %v515_v37 = vld [vmem:[%s688_s29 + $0x48] sm:$0xf0]  ;;  %v514_v38 = vor.u32 %v555_v35, %v513_v34  ;;  %v286_v39 = vld [vmem:[%s745_s2] sm:$0xff]  ;;  %v505_v41 = vld [vmem:[%s688_s29 + $0x30] sm:$0xf]  ;;  %v612_v43 = vmov 0  }
  0x2f   : > { %v518_v40 = vor.u32 %v554_v36, %v515_v37  ;;  %v553_v42 = vld [vmem:[%s688_s29 + $0x34] sm:$0xf0]  ;;  %587 = vset.pattern.permute.xlu0 %v612_v43  ;;  %v552_v44 = vld [vmem:[%s688_s29 + $0x34] sm:$0xf]  ;;  %v507_v45 = vld [vmem:[%s688_s29 + $0x38] sm:$0xf0] }
  0x30   : > { %373 = vmatpush.bf16.msra.mxu0 %v530_v26  ;;  %289 = vperm.xlu0 %587, %v286_v39   ;;  %v506_v46 = vor.u32 %v553_v42, %v505_v41  ;;  %v510_v47 = vor.u32 %v552_v44, %v507_v45  ;;  %v497_v48 = vld [vmem:[%s688_s29 + $0x20] sm:$0xf]  ;;  %v551_v49 = vld [vmem:[%s688_s29 + $0x24] sm:$0xf0]  ;;  %v550_v50 = vld [vmem:[%s688_s29 + $0x24] sm:$0xf] }
  0x31   : > { %386 = vmatpush.bf16.msra.mxu1 %v534_v27  ;;  %v499_v51 = vld [vmem:[%s688_s29 + $0x28] sm:$0xf0]  ;;  %v498_v52 = vor.u32 %v551_v49, %v497_v48  ;;  %v489_v54 = vld [vmem:[%s688_s29 + $0x10] sm:$0xf]  ;;  %v549_v55 = vld [vmem:[%s688_s29 + $0x14] sm:$0xf0] }
  0x32   : > { %v502_v53 = vor.u32 %v550_v50, %v499_v51  ;;  %v548_v56 = vld [vmem:[%s688_s29 + $0x14] sm:$0xf]  ;;  %v491_v57 = vld [vmem:[%s688_s29 + $0x18] sm:$0xf0]  ;;  %v490_v58 = vor.u32 %v549_v55, %v489_v54  ;;  %v481_v60 = vld [vmem:[%s688_s29] sm:$0xf] }
  0x33   : > { %v494_v59 = vor.u32 %v548_v56, %v491_v57  ;;  %v547_v61 = vld [vmem:[%s688_s29 + $0x4] sm:$0xf0]  ;;  %v546_v62 = vld [vmem:[%s688_s29 + $0x4] sm:$0xf]  ;;  %v483_v63 = vld [vmem:[%s688_s29 + $0x8] sm:$0xf0] }
  0x34   : > { %374 = vmatpush.bf16.msra.mxu0 %v522_v32  ;;  %v482_v0 = vor.u32 %v547_v61, %v481_v60  ;;  %v486_v1 = vor.u32 %v546_v62, %v483_v63  ;;  %v269_v2 = vld [vmem:[%s743_s0] sm:$0xf]  ;;  %s751_s7 = smov (!%p264_p8, %s477_s7), 3 }
  0x35   : > { %387 = vmatpush.bf16.msra.mxu1 %v526_v33  ;;  %s478_s8 = sshll.u32 %s751_s7, 3 }
  0x36   : > { %s267_s11 = scalar_lea.vmem %s746_s3, %s478_s8 }
  0x38   : > { %375 = vmatpush.bf16.msra.mxu0 %v514_v38 }
  0x39   : > { %388 = vmatpush.bf16.msra.mxu1 %v518_v40 }
  0x3c   : > { %376 = vmatpush.bf16.msra.mxu0 %v506_v46 }
  0x3d   : > { %389 = vmatpush.bf16.msra.mxu1 %v510_v47 }
  0x40   : > { %377 = vmatpush.bf16.msra.mxu0 %v498_v52 }
  0x41   : > { %390 = vmatpush.bf16.msra.mxu1 %v502_v53 }
  0x44   : > { %378 = vmatpush.bf16.msra.mxu0 %v490_v58 }
  0x45   : > { %391 = vmatpush.bf16.msra.mxu1 %v494_v59 }
  0x48   : > { %379 = vmatpush.bf16.msra.mxu0 %v482_v0 }
  0x49   : > { %392 = vmatpush.bf16.msra.mxu1 %v486_v1 }
  0x4b   : > { %380 = vmatmul.bf16.vlgmr.msra.gmra.mxu0 %v269_v2 }
  0x4c   : > { %393 = vmatmul.bf16.vlgmr.msra.gmra.mxu1 %v269_v2 }
  0xa2   : > { %v290_v3 = vpop.permute.xlu0 %289 }
  0xc8   : > { %v381_v4 = vpop.f32.mrf.mxu0 }
  0xc9   : > { %v382_v5 = vadd.f32 %v381_v4, %v290_v3  ;;  %v394_v6 = vpop.f32.mrf.mxu1 }
  0xca   : > { %v395_v7 = vadd.f32 %v394_v6, %v290_v3 }
  0xcb   : > { %vm398_vm0 = vcmp.ge.f32.partialorder %v382_v5, 0.0  ;;  %v400_v8 = vmul.f32 0.2, %v382_v5 }
  0xcc   : > { %vm399_vm1 = vcmp.ge.f32.partialorder %v395_v7, 0.0  ;;  %v401_v9 = vmul.f32 0.2, %v395_v7 }
  0xcd   : > { %v402_v10 = vsel %vm398_vm0, %v382_v5, %v400_v8 }
  0xce   : > { %404 = vst [vmem:[%s267_s11] sm:$0xff] %v402_v10  ;;  %v403_v11 = vsel %vm399_vm1, %v395_v7, %v401_v9 }
  0xcf   : > { %405 = vst [vmem:[%s267_s11 + $0x8] sm:$0xff] %v403_v11 }
  0xd0   : > { %v383_v12 = vpop.f32.mrf.mxu0 }
  0xd1   : > { %v396_v13 = vpop.f32.mrf.mxu1 }
  0xd2 PF: > { %p10_p9 = scmp.ge.s32.totalorder %s650_s16, 4   ;;  %s747_s12 = smov %s606_s13 }
  0xd3   : > { %s748_s13 = smov %s659_s19  ;;  %s749_s14 = smov %s650_s16 }
  0xd4   :  { %12 = sbr.rel (!%p10_p9) target bundleno = 2 (0x2), region = 105 }

// kernel: discriminator_forward.9
= control target key start
LH: loop header
LB: loop body
LE: loop exit
PB: predicated region body
PF: predicated region fallthrough
CT: control target
= control target key end

     0   :  { %s204_s1 = inlined_call_operand.vmem [shape: bf16[128,128], index: 1, kind: input, shape index: {}]   ;;  %s205_s2 = inlined_call_operand.vmem [shape: f32[16,1], index: 2, kind: input, shape index: {}]   ;;  %s206_s0 = inlined_call_operand.vmem [shape: bf16[16,128], index: 0, kind: input, shape index: {}]   ;;  %s207_s3 = inlined_call_operand.vmem [shape: f32[16,128], index: 3, kind: output, shape index: {}]  }
   0x1   :  { %v150_v0 = vld [vmem:[%s204_s1 + $0x38] sm:$0xff]  ;;  %v149_v1 = vld [vmem:[%s204_s1 + $0x30] sm:$0xff]  ;;  %v148_v2 = vld [vmem:[%s204_s1 + $0x28] sm:$0xff] }
   0x2   :  { %86 = vmatpush.bf16.msra.mxu0 %v150_v0  ;;  %v147_v3 = vld [vmem:[%s204_s1 + $0x20] sm:$0xff]  ;;  %v146_v4 = vld [vmem:[%s204_s1 + $0x18] sm:$0xff]  ;;  %v145_v5 = vld [vmem:[%s204_s1 + $0x10] sm:$0xff] }
   0x3   :  { %v144_v6 = vld [vmem:[%s204_s1 + $0x8] sm:$0xff]  ;;  %v143_v7 = vld [vmem:[%s204_s1] sm:$0xff] }
   0x4   :  { %v142_v8 = vld [vmem:[%s206_s0] sm:$0xff] }
   0x6   :  { %87 = vmatpush.bf16.msra.mxu0 %v149_v1 }
   0xa   :  { %88 = vmatpush.bf16.msra.mxu0 %v148_v2 }
   0xe   :  { %89 = vmatpush.bf16.msra.mxu0 %v147_v3 }
  0x12   :  { %90 = vmatpush.bf16.msra.mxu0 %v146_v4 }
  0x16   :  { %91 = vmatpush.bf16.msra.mxu0 %v145_v5 }
  0x1a   :  { %92 = vmatpush.bf16.msra.mxu0 %v144_v6 }
  0x1e   :  { %93 = vmatpush.bf16.msra.mxu0 %v143_v7 }
  0x21   :  { %94 = vmatmul.bf16.vlgmr.msra.gmra.mxu0 %v142_v8 }
  0x9e   :  { %v95_v9 = vpop.f32.mrf.mxu0 }
  0x9f   :  { %100 = vst [vmem:[%s207_s3] sm:$0xff] %v95_v9 }
  0xa6   :  { %v97_v10 = vpop.f32.mrf.mxu0 }
  0xa7   :  { %101 = vst [vmem:[%s207_s3 + $0x8] sm:$0xff] %v97_v10 }

// kernel: discriminator_forward.10
= control target key start
LH: loop header
LB: loop body
LE: loop exit
PB: predicated region body
PF: predicated region fallthrough
CT: control target
= control target key end

     0   :  { %v54_v0 = vmov 1   ;;  %v55_v1 = vmov 0   ;;  %s89_s1 = inlined_call_operand.vmem [shape: f32[16,2], index: 1, kind: input, shape index: {}]   ;;  %s90_s0 = inlined_call_operand.vmem [shape: f32[16,128], index: 0, kind: input, shape index: {}]   ;;  %s91_s2 = inlined_call_operand.vmem [shape: f32[16,128], index: 2, kind: output, shape index: {}]  }
   0x1   :  { %52 = vset.pattern.permute.xlu1 %v54_v0  ;;  %51 = vset.pattern.permute.xlu0 %v55_v1  ;;  %v13_v2 = vld [vmem:[%s89_s1] sm:$0xff]  ;;  %v14_v3 = vld [vmem:[%s89_s1 + $0x8] sm:$0xff] }
   0x2   :  { %28 = vperm.xlu1 %52, %v13_v2   ;;  %17 = vperm.xlu0 %51, %v13_v2   ;;  %v11_v4 = vld [vmem:[%s90_s0] sm:$0xff]  ;;  %v12_v10 = vld [vmem:[%s90_s0 + $0x8] sm:$0xff] }
   0xa   :  { %32 = vperm.xlu1 %52, %v14_v3   ;;  %22 = vperm.xlu0 %51, %v14_v3  }
  0x12   :  { %53 = vset.pattern.permute.xlu0 %v54_v0 }
  0x74   :  { %v29_v5 = vpop.permute.xlu1 %28  ;;  %v18_v6 = vpop.permute.xlu0 %17 }
  0x75   :  { %v25_v7 = vmul.f32 %v18_v6, %v11_v4 }
  0x77   :  { %v35_v8 = vadd.f32 %v29_v5, %v25_v7 }
  0x79   :  { %vm37_vm0 = vcmp.ge.f32.partialorder %v35_v8, 0.0  ;;  %v39_v9 = vmul.f32 0.2, %v35_v8 }
  0x7b   :  { %v41_v11 = vsel %vm37_vm0, %v35_v8, %v39_v9 }
  0x7c   :  { %43 = vst [vmem:[%s91_s2] sm:$0xff] %v41_v11  ;;  %v23_v12 = vpop.permute.xlu0 %22  ;;  %v33_v14 = vpop.permute.xlu1 %32 }
  0x7d   :  { %v26_v13 = vmul.f32 %v23_v12, %v12_v10 }
  0x7f   :  { %v36_v15 = vadd.f32 %v33_v14, %v26_v13 }
  0x81   :  { %vm38_vm1 = vcmp.ge.f32.partialorder %v36_v15, 0.0  ;;  %v40_v16 = vmul.f32 0.2, %v36_v15 }
  0x83   :  { %v42_v17 = vsel %vm38_vm1, %v36_v15, %v40_v16 }
  0x84   :  { %44 = vst [vmem:[%s91_s2 + $0x8] sm:$0xff] %v42_v17 }

// kernel: discriminator_forward.11
= control target key start
LH: loop header
LB: loop body
LE: loop exit
PB: predicated region body
PF: predicated region fallthrough
CT: control target
= control target key end

     0   :  { %s432_s1 = inlined_call_operand.vmem [shape: bf16[256,128], index: 1, kind: input, shape index: {}]   ;;  %s433_s2 = inlined_call_operand.vmem [shape: f32[32,1], index: 2, kind: input, shape index: {}]   ;;  %s434_s0 = inlined_call_operand.vmem [shape: bf16[32,256], index: 0, kind: input, shape index: {}]   ;;  %s435_s3 = inlined_call_operand.vmem [shape: f32[32,128], index: 3, kind: output, shape index: {}]  }
   0x1   :  { %v303_v0 = vld [vmem:[%s432_s1 + $0x38] sm:$0xff]  ;;  %v302_v2 = vld [vmem:[%s432_s1 + $0x30] sm:$0xff]  ;;  %v301_v4 = vld [vmem:[%s432_s1 + $0x28] sm:$0xff] }
   0x2   :  { %v311_v1 = vld [vmem:[%s432_s1 + $0x78] sm:$0xff]  ;;  %166 = vmatpush.bf16.msra.mxu0 %v303_v0  ;;  %312 = vmatpush.bf16.msra.mxu2 %v303_v0  ;;  %v310_v3 = vld [vmem:[%s432_s1 + $0x70] sm:$0xff]  ;;  %v309_v5 = vld [vmem:[%s432_s1 + $0x68] sm:$0xff] }
   0x3   :  { %185 = vmatpush.bf16.msra.mxu1 %v311_v1  ;;  %320 = vmatpush.bf16.msra.mxu3 %v311_v1  ;;  %v300_v6 = vld [vmem:[%s432_s1 + $0x20] sm:$0xff]  ;;  %v299_v8 = vld [vmem:[%s432_s1 + $0x18] sm:$0xff]  ;;  %v298_v10 = vld [vmem:[%s432_s1 + $0x10] sm:$0xff] }
   0x4   :  { %v308_v7 = vld [vmem:[%s432_s1 + $0x60] sm:$0xff]  ;;  %v307_v9 = vld [vmem:[%s432_s1 + $0x58] sm:$0xff]  ;;  %v306_v11 = vld [vmem:[%s432_s1 + $0x50] sm:$0xff] }
   0x5   :  { %v297_v12 = vld [vmem:[%s432_s1 + $0x8] sm:$0xff]  ;;  %v296_v14 = vld [vmem:[%s432_s1] sm:$0xff]  ;;  %v222_v18 = vld [vmem:[%s434_s0 + $0x10] sm:$0xf] }
   0x6   :  { %167 = vmatpush.bf16.msra.mxu0 %v302_v2  ;;  %313 = vmatpush.bf16.msra.mxu2 %v302_v2  ;;  %v305_v13 = vld [vmem:[%s432_s1 + $0x48] sm:$0xff]  ;;  %v304_v15 = vld [vmem:[%s432_s1 + $0x40] sm:$0xff]  ;;  %v295_v19 = vld [vmem:[%s434_s0 + $0x14] sm:$0xf0] }
   0x7   :  { %186 = vmatpush.bf16.msra.mxu1 %v310_v3  ;;  %321 = vmatpush.bf16.msra.mxu3 %v310_v3  ;;  %v214_v16 = vld [vmem:[%s434_s0] sm:$0xf]  ;;  %v293_v17 = vld [vmem:[%s434_s0 + $0x4] sm:$0xf0]  ;;  %v292_v20 = vld [vmem:[%s434_s0 + $0x4] sm:$0xf]  ;;  %v223_v25 = vor.u32 %v295_v19, %v222_v18 }
   0x8   :  { %v216_v21 = vld [vmem:[%s434_s0 + $0x8] sm:$0xf0]  ;;  %v294_v22 = vld [vmem:[%s434_s0 + $0x14] sm:$0xf]  ;;  %v224_v23 = vld [vmem:[%s434_s0 + $0x18] sm:$0xf0]  ;;  %v215_v24 = vor.u32 %v293_v17, %v214_v16 }
   0x9   :  { %v219_v26 = vor.u32 %v292_v20, %v216_v21  ;;  %v227_v27 = vor.u32 %v294_v22, %v224_v23 }
   0xa   :  { %168 = vmatpush.bf16.msra.mxu0 %v301_v4  ;;  %314 = vmatpush.bf16.msra.mxu2 %v301_v4 }
   0xb   :  { %187 = vmatpush.bf16.msra.mxu1 %v309_v5  ;;  %322 = vmatpush.bf16.msra.mxu3 %v309_v5 }
   0xe   :  { %169 = vmatpush.bf16.msra.mxu0 %v300_v6  ;;  %315 = vmatpush.bf16.msra.mxu2 %v300_v6 }
   0xf   :  { %188 = vmatpush.bf16.msra.mxu1 %v308_v7  ;;  %323 = vmatpush.bf16.msra.mxu3 %v308_v7 }
  0x12   :  { %170 = vmatpush.bf16.msra.mxu0 %v299_v8  ;;  %316 = vmatpush.bf16.msra.mxu2 %v299_v8 }
  0x13   :  { %189 = vmatpush.bf16.msra.mxu1 %v307_v9  ;;  %324 = vmatpush.bf16.msra.mxu3 %v307_v9 }
  0x16   :  { %171 = vmatpush.bf16.msra.mxu0 %v298_v10  ;;  %317 = vmatpush.bf16.msra.mxu2 %v298_v10 }
  0x17   :  { %190 = vmatpush.bf16.msra.mxu1 %v306_v11  ;;  %325 = vmatpush.bf16.msra.mxu3 %v306_v11 }
  0x1a   :  { %172 = vmatpush.bf16.msra.mxu0 %v297_v12  ;;  %318 = vmatpush.bf16.msra.mxu2 %v297_v12 }
  0x1b   :  { %191 = vmatpush.bf16.msra.mxu1 %v305_v13  ;;  %326 = vmatpush.bf16.msra.mxu3 %v305_v13 }
  0x1e   :  { %173 = vmatpush.bf16.msra.mxu0 %v296_v14  ;;  %319 = vmatpush.bf16.msra.mxu2 %v296_v14 }
  0x1f   :  { %192 = vmatpush.bf16.msra.mxu1 %v304_v15  ;;  %327 = vmatpush.bf16.msra.mxu3 %v304_v15 }
  0x21   :  { %174 = vmatmul.bf16.vlgmr.msra.gmra.mxu0 %v215_v24  ;;  %179 = vmatmul.bf16.vlgmr.msra.gmra.mxu2 %v223_v25 }
  0x22   :  { %193 = vmatmul.bf16.vlgmr.msra.gmra.mxu1 %v219_v26  ;;  %198 = vmatmul.bf16.vlgmr.msra.gmra.mxu3 %v227_v27 }
  0x9e   :  { %v175_v28 = vpop.f32.mrf.mxu0 }
  0x9f   :  { %v194_v29 = vpop.f32.mrf.mxu1 }
  0xa0   :  { %v195_v30 = vadd.f32 %v194_v29, %v175_v28 }
  0xa2   :  { %204 = vst [vmem:[%s435_s3] sm:$0xff] %v195_v30 }
  0xa4   :  { %v180_v31 = vpop.f32.mrf.mxu2 }
  0xa5   :  { %v199_v32 = vpop.f32.mrf.mxu3 }
  0xa6   :  { %v200_v33 = vadd.f32 %v199_v32, %v180_v31  ;;  %v177_v34 = vpop.f32.mrf.mxu0 }
  0xa7   :  { %v196_v35 = vpop.f32.mrf.mxu1 }
  0xa8   :  { %206 = vst [vmem:[%s435_s3 + $0x10] sm:$0xff] %v200_v33  ;;  %v197_v36 = vadd.f32 %v196_v35, %v177_v34 }
  0xaa   :  { %205 = vst [vmem:[%s435_s3 + $0x8] sm:$0xff] %v197_v36 }
  0xac   :  { %v182_v37 = vpop.f32.mrf.mxu2 }
  0xad   :  { %v201_v38 = vpop.f32.mrf.mxu3 }
  0xae   :  { %v202_v39 = vadd.f32 %v201_v38, %v182_v37 }
  0xb0   :  { %207 = vst [vmem:[%s435_s3 + $0x18] sm:$0xff] %v202_v39 }

// kernel: discriminator_forward.12
= control target key start
LH: loop header
LB: loop body
LE: loop exit
PB: predicated region body
PF: predicated region fallthrough
CT: control target
= control target key end

     0   :  { %v90_v0 = vmov 0   ;;  %v91_v3 = vmov 1   ;;  %s143_s1 = inlined_call_operand.vmem [shape: f32[32,2], index: 1, kind: input, shape index: {}]   ;;  %s144_s0 = inlined_call_operand.vmem [shape: f32[32,128], index: 0, kind: input, shape index: {}]   ;;  %s145_s2 = inlined_call_operand.vmem [shape: f32[32,128], index: 2, kind: output, shape index: {}]  }
   0x1   :  { %86 = vset.pattern.permute.xlu1 %v90_v0  ;;  %85 = vset.pattern.permute.xlu0 %v90_v0  ;;  %v17_v1 = vld [vmem:[%s143_s1 + $0x10] sm:$0xff]  ;;  %v15_v2 = vld [vmem:[%s143_s1] sm:$0xff]  ;;  %v18_v4 = vld [vmem:[%s143_s1 + $0x18] sm:$0xff] }
   0x2   :  { %31 = vperm.xlu1 %86, %v17_v1   ;;  %21 = vperm.xlu0 %85, %v15_v2   ;;  %v16_v5 = vld [vmem:[%s143_s1 + $0x8] sm:$0xff]  ;;  %v11_v7 = vld [vmem:[%s144_s0] sm:$0xff]  ;;  %v13_v20 = vld [vmem:[%s144_s0 + $0x10] sm:$0xff] }
   0x3   :  { %87 = vset.pattern.permute.xlu2 %v91_v3  ;;  %v12_v13 = vld [vmem:[%s144_s0 + $0x8] sm:$0xff]  ;;  %v14_v21 = vld [vmem:[%s144_s0 + $0x18] sm:$0xff] }
   0x4   :  { %44 = vperm.xlu2 %87, %v15_v2  }
   0xa   :  { %36 = vperm.xlu1 %86, %v18_v4   ;;  %26 = vperm.xlu0 %85, %v16_v5  }
   0xc   :  { %48 = vperm.xlu2 %87, %v16_v5  }
  0x12   :  { %89 = vset.pattern.permute.xlu1 %v91_v3  ;;  %88 = vset.pattern.permute.xlu0 %v91_v3 }
  0x13   :  { %56 = vperm.xlu1 %89, %v18_v4   ;;  %52 = vperm.xlu0 %88, %v17_v1  }
  0x5e   :  { %v45_v6 = vpop.permute.xlu2 %44 }
  0x66   :  { %v49_v15 = vpop.permute.xlu2 %48 }
  0x74   :  { %v32_v8 = vpop.permute.xlu1 %31  ;;  %v22_v9 = vpop.permute.xlu0 %21 }
  0x75   :  { %v39_v10 = vmul.f32 %v22_v9, %v11_v7  ;;  %v41_v24 = vmul.f32 %v32_v8, %v13_v20 }
  0x77   :  { %v59_v11 = vadd.f32 %v45_v6, %v39_v10 }
  0x79   :  { %vm63_vm0 = vcmp.ge.f32.partialorder %v59_v11, 0.0  ;;  %v67_v12 = vmul.f32 0.2, %v59_v11 }
  0x7b   :  { %v71_v14 = vsel %vm63_vm0, %v59_v11, %v67_v12 }
  0x7c   :  { %75 = vst [vmem:[%s145_s2] sm:$0xff] %v71_v14  ;;  %v37_v16 = vpop.permute.xlu1 %36  ;;  %v27_v17 = vpop.permute.xlu0 %26 }
  0x7d   :  { %v40_v18 = vmul.f32 %v27_v17, %v12_v13  ;;  %v42_v25 = vmul.f32 %v37_v16, %v14_v21 }
  0x7f   :  { %v60_v19 = vadd.f32 %v49_v15, %v40_v18 }
  0x81   :  { %vm64_vm1 = vcmp.ge.f32.partialorder %v60_v19, 0.0  ;;  %v68_v22 = vmul.f32 0.2, %v60_v19 }
  0x83   :  { %v72_v23 = vsel %vm64_vm1, %v60_v19, %v68_v22 }
  0x84   :  { %76 = vst [vmem:[%s145_s2 + $0x8] sm:$0xff] %v72_v23 }
  0x85   :  { %v57_v26 = vpop.permute.xlu1 %56  ;;  %v53_v27 = vpop.permute.xlu0 %52 }
  0x86   :  { %v62_v28 = vadd.f32 %v57_v26, %v42_v25  ;;  %v61_v29 = vadd.f32 %v53_v27, %v41_v24 }
  0x88   :  { %vm66_vm2 = vcmp.ge.f32.partialorder %v62_v28, 0.0  ;;  %v70_v30 = vmul.f32 0.2, %v62_v28  ;;  %vm65_vm3 = vcmp.ge.f32.partialorder %v61_v29, 0.0  ;;  %v69_v31 = vmul.f32 0.2, %v61_v29 }
  0x8a   :  { %v74_v32 = vsel %vm66_vm2, %v62_v28, %v70_v30  ;;  %v73_v33 = vsel %vm65_vm3, %v61_v29, %v69_v31 }
  0x8b   :  { %78 = vst [vmem:[%s145_s2 + $0x18] sm:$0xff] %v74_v32 }
  0x8c   :  { %77 = vst [vmem:[%s145_s2 + $0x10] sm:$0xff] %v73_v33 }

// kernel: discriminator_forward.13
= control target key start
LH: loop header
LB: loop body
LE: loop exit
PB: predicated region body
PF: predicated region fallthrough
CT: control target
= control target key end

     0   :  { %s874_s1 = inlined_call_operand.vmem [shape: bf16[512,128], index: 1, kind: input, shape index: {}]   ;;  %s875_s2 = inlined_call_operand.vmem [shape: f32[48,1], index: 2, kind: input, shape index: {}]   ;;  %s876_s0 = inlined_call_operand.vmem [shape: bf16[48,512], index: 0, kind: input, shape index: {}]   ;;  %s877_s3 = inlined_call_operand.vmem [shape: f32[48,128], index: 3, kind: output, shape index: {}]  }
   0x1   :  { %v643_v0 = vld [vmem:[%s874_s1 + $0x38] sm:$0xff]  ;;  %v642_v4 = vld [vmem:[%s874_s1 + $0x30] sm:$0xff]  ;;  %v641_v8 = vld [vmem:[%s874_s1 + $0x28] sm:$0xff] }
   0x2   :  { %v651_v1 = vld [vmem:[%s874_s1 + $0x78] sm:$0xff]  ;;  %342 = vmatpush.bf16.msra.mxu0 %v643_v0  ;;  %v650_v5 = vld [vmem:[%s874_s1 + $0x70] sm:$0xff]  ;;  %v649_v9 = vld [vmem:[%s874_s1 + $0x68] sm:$0xff] }
   0x3   :  { %v659_v2 = vld [vmem:[%s874_s1 + $0xb8] sm:$0xff]  ;;  %366 = vmatpush.bf16.msra.mxu1 %v651_v1  ;;  %v658_v6 = vld [vmem:[%s874_s1 + $0xb0] sm:$0xff]  ;;  %v657_v10 = vld [vmem:[%s874_s1 + $0xa8] sm:$0xff] }
   0x4   :  { %v667_v3 = vld [vmem:[%s874_s1 + $0xf8] sm:$0xff]  ;;  %390 = vmatpush.bf16.msra.mxu2 %v659_v2  ;;  %v666_v7 = vld [vmem:[%s874_s1 + $0xf0] sm:$0xff]  ;;  %v665_v11 = vld [vmem:[%s874_s1 + $0xe8] sm:$0xff] }
   0x5   :  { %414 = vmatpush.bf16.msra.mxu3 %v667_v3  ;;  %v640_v12 = vld [vmem:[%s874_s1 + $0x20] sm:$0xff]  ;;  %v639_v16 = vld [vmem:[%s874_s1 + $0x18] sm:$0xff]  ;;  %v638_v20 = vld [vmem:[%s874_s1 + $0x10] sm:$0xff] }
   0x6   :  { %343 = vmatpush.bf16.msra.mxu0 %v642_v4  ;;  %v648_v13 = vld [vmem:[%s874_s1 + $0x60] sm:$0xff]  ;;  %v647_v17 = vld [vmem:[%s874_s1 + $0x58] sm:$0xff]  ;;  %v646_v21 = vld [vmem:[%s874_s1 + $0x50] sm:$0xff] }
   0x7   :  { %367 = vmatpush.bf16.msra.mxu1 %v650_v5  ;;  %v656_v14 = vld [vmem:[%s874_s1 + $0xa0] sm:$0xff]  ;;  %v655_v18 = vld [vmem:[%s874_s1 + $0x98] sm:$0xff]  ;;  %v654_v22 = vld [vmem:[%s874_s1 + $0x90] sm:$0xff] }
   0x8   :  { %391 = vmatpush.bf16.msra.mxu2 %v658_v6  ;;  %v664_v15 = vld [vmem:[%s874_s1 + $0xe0] sm:$0xff]  ;;  %v663_v19 = vld [vmem:[%s874_s1 + $0xd8] sm:$0xff]  ;;  %v662_v23 = vld [vmem:[%s874_s1 + $0xd0] sm:$0xff] }
   0x9   :  { %415 = vmatpush.bf16.msra.mxu3 %v666_v7  ;;  %v637_v24 = vld [vmem:[%s874_s1 + $0x8] sm:$0xff]  ;;  %v636_v28 = vld [vmem:[%s874_s1] sm:$0xff]  ;;  %v626_v33 = vld [vmem:[%s876_s0 + $0xc] sm:$0xf0] }
   0xa   :  { %344 = vmatpush.bf16.msra.mxu0 %v641_v8  ;;  %v645_v25 = vld [vmem:[%s874_s1 + $0x48] sm:$0xff]  ;;  %v644_v29 = vld [vmem:[%s874_s1 + $0x40] sm:$0xff]  ;;  %v452_v35 = vld [vmem:[%s876_s0 + $0x10] sm:$0xf0] }
   0xb   :  { %368 = vmatpush.bf16.msra.mxu1 %v649_v9  ;;  %v653_v26 = vld [vmem:[%s874_s1 + $0x88] sm:$0xff]  ;;  %v652_v30 = vld [vmem:[%s874_s1 + $0x80] sm:$0xff]  ;;  %v627_v37 = vld [vmem:[%s876_s0 + $0x14] sm:$0xf0] }
   0xc   :  { %392 = vmatpush.bf16.msra.mxu2 %v657_v10  ;;  %v661_v27 = vld [vmem:[%s874_s1 + $0xc8] sm:$0xff]  ;;  %v660_v31 = vld [vmem:[%s874_s1 + $0xc0] sm:$0xff]  ;;  %v460_v39 = vld [vmem:[%s876_s0 + $0x18] sm:$0xf0] }
   0xd   :  { %416 = vmatpush.bf16.msra.mxu3 %v665_v11  ;;  %v450_v32 = vld [vmem:[%s876_s0] sm:$0xf]  ;;  %v624_v34 = vld [vmem:[%s876_s0 + $0x4] sm:$0xf]  ;;  %v458_v36 = vld [vmem:[%s876_s0 + $0x8] sm:$0xf] }
   0xe   :  { %345 = vmatpush.bf16.msra.mxu0 %v640_v12  ;;  %v625_v38 = vld [vmem:[%s876_s0 + $0xc] sm:$0xf]  ;;  %v451_v40 = vor.u32 %v626_v33, %v450_v32  ;;  %v455_v41 = vor.u32 %v624_v34, %v452_v35  ;;  %v459_v42 = vor.u32 %v627_v37, %v458_v36  ;;  %v466_v44 = vld [vmem:[%s876_s0 + $0x20] sm:$0xf]  ;;  %v630_v45 = vld [vmem:[%s876_s0 + $0x2c] sm:$0xf0] }
   0xf   :  { %369 = vmatpush.bf16.msra.mxu1 %v648_v13  ;;  %v463_v43 = vor.u32 %v625_v38, %v460_v39  ;;  %v628_v46 = vld [vmem:[%s876_s0 + $0x24] sm:$0xf]  ;;  %v468_v47 = vld [vmem:[%s876_s0 + $0x30] sm:$0xf0]  ;;  %v474_v48 = vld [vmem:[%s876_s0 + $0x28] sm:$0xf]  ;;  %v467_v52 = vor.u32 %v630_v45, %v466_v44 }
  0x10   :  { %393 = vmatpush.bf16.msra.mxu2 %v656_v14  ;;  %v631_v49 = vld [vmem:[%s876_s0 + $0x34] sm:$0xf0]  ;;  %v629_v50 = vld [vmem:[%s876_s0 + $0x2c] sm:$0xf]  ;;  %v476_v51 = vld [vmem:[%s876_s0 + $0x38] sm:$0xf0]  ;;  %v471_v53 = vor.u32 %v628_v46, %v468_v47 }
  0x11   :  { %417 = vmatpush.bf16.msra.mxu3 %v664_v15  ;;  %v475_v54 = vor.u32 %v631_v49, %v474_v48  ;;  %v479_v55 = vor.u32 %v629_v50, %v476_v51  ;;  %v482_v56 = vld [vmem:[%s876_s0 + $0x40] sm:$0xf]  ;;  %v634_v57 = vld [vmem:[%s876_s0 + $0x4c] sm:$0xf0]  ;;  %v632_v58 = vld [vmem:[%s876_s0 + $0x44] sm:$0xf] }
  0x12   :  { %346 = vmatpush.bf16.msra.mxu0 %v639_v16  ;;  %v484_v59 = vld [vmem:[%s876_s0 + $0x50] sm:$0xf0]  ;;  %v490_v60 = vld [vmem:[%s876_s0 + $0x48] sm:$0xf]  ;;  %v635_v61 = vld [vmem:[%s876_s0 + $0x54] sm:$0xf0]  ;;  %v483_v0 = vor.u32 %v634_v57, %v482_v56 }
  0x13   :  { %370 = vmatpush.bf16.msra.mxu1 %v647_v17  ;;  %v633_v62 = vld [vmem:[%s876_s0 + $0x4c] sm:$0xf]  ;;  %v492_v63 = vld [vmem:[%s876_s0 + $0x58] sm:$0xf0]  ;;  %v487_v1 = vor.u32 %v632_v58, %v484_v59  ;;  %v491_v2 = vor.u32 %v635_v61, %v490_v60 }
  0x14   :  { %394 = vmatpush.bf16.msra.mxu2 %v655_v18  ;;  %v495_v3 = vor.u32 %v633_v62, %v492_v63 }
  0x15   :  { %418 = vmatpush.bf16.msra.mxu3 %v663_v19 }
  0x16   :  { %347 = vmatpush.bf16.msra.mxu0 %v638_v20 }
  0x17   :  { %371 = vmatpush.bf16.msra.mxu1 %v646_v21 }
  0x18   :  { %395 = vmatpush.bf16.msra.mxu2 %v654_v22 }
  0x19   :  { %419 = vmatpush.bf16.msra.mxu3 %v662_v23 }
  0x1a   :  { %348 = vmatpush.bf16.msra.mxu0 %v637_v24 }
  0x1b   :  { %372 = vmatpush.bf16.msra.mxu1 %v645_v25 }
  0x1c   :  { %396 = vmatpush.bf16.msra.mxu2 %v653_v26 }
  0x1d   :  { %420 = vmatpush.bf16.msra.mxu3 %v661_v27 }
  0x1e   :  { %349 = vmatpush.bf16.msra.mxu0 %v636_v28 }
  0x1f   :  { %373 = vmatpush.bf16.msra.mxu1 %v644_v29 }
  0x20   :  { %397 = vmatpush.bf16.msra.mxu2 %v652_v30 }
  0x21   :  { %421 = vmatpush.bf16.msra.mxu3 %v660_v31  ;;  %350 = vmatmul.bf16.vlgmr.msra.gmra.mxu0 %v451_v40 }
  0x22   :  { %374 = vmatmul.bf16.vlgmr.msra.gmra.mxu1 %v455_v41 }
  0x23   :  { %398 = vmatmul.bf16.vlgmr.msra.gmra.mxu2 %v459_v42 }
  0x24   :  { %422 = vmatmul.bf16.vlgmr.msra.gmra.mxu3 %v463_v43 }
  0x31   :  { %355 = vmatmul.bf16.gmra.mxu0 %v467_v52 }
  0x32   :  { %379 = vmatmul.bf16.gmra.mxu1 %v471_v53 }
  0x33   :  { %403 = vmatmul.bf16.gmra.mxu2 %v475_v54 }
  0x34   :  { %427 = vmatmul.bf16.gmra.mxu3 %v479_v55 }
  0x41   :  { %360 = vmatmul.bf16.gmra.mxu0 %v483_v0 }
  0x42   :  { %384 = vmatmul.bf16.gmra.mxu1 %v487_v1 }
  0x43   :  { %408 = vmatmul.bf16.gmra.mxu2 %v491_v2 }
  0x44   :  { %432 = vmatmul.bf16.gmra.mxu3 %v495_v3 }
  0x9e   :  { %v351_v4 = vpop.f32.mrf.mxu0 }
  0x9f   :  { %v375_v5 = vpop.f32.mrf.mxu1 }
  0xa0   :  { %v376_v6 = vadd.f32 %v375_v5, %v351_v4 }
  0xa6   :  { %v399_v7 = vpop.f32.mrf.mxu2  ;;  %v353_v10 = vpop.f32.mrf.mxu0 }
  0xa7   :  { %v423_v8 = vpop.f32.mrf.mxu3  ;;  %v400_v9 = vadd.f32 %v399_v7, %v376_v6  ;;  %v377_v11 = vpop.f32.mrf.mxu1 }
  0xa8   :  { %v378_v13 = vadd.f32 %v377_v11, %v353_v10 }
  0xa9   :  { %v424_v12 = vadd.f32 %v423_v8, %v400_v9 }
  0xab   :  { %438 = vst [vmem:[%s877_s3] sm:$0xff] %v424_v12 }
  0xae   :  { %v401_v14 = vpop.f32.mrf.mxu2  ;;  %v356_v17 = vpop.f32.mrf.mxu0 }
  0xaf   :  { %v425_v15 = vpop.f32.mrf.mxu3  ;;  %v402_v16 = vadd.f32 %v401_v14, %v378_v13  ;;  %v380_v18 = vpop.f32.mrf.mxu1 }
  0xb0   :  { %v381_v20 = vadd.f32 %v380_v18, %v356_v17 }
  0xb1   :  { %v426_v19 = vadd.f32 %v425_v15, %v402_v16 }
  0xb3   :  { %439 = vst [vmem:[%s877_s3 + $0x8] sm:$0xff] %v426_v19 }
  0xb6   :  { %v404_v21 = vpop.f32.mrf.mxu2  ;;  %v358_v24 = vpop.f32.mrf.mxu0 }
  0xb7   :  { %v428_v22 = vpop.f32.mrf.mxu3  ;;  %v405_v23 = vadd.f32 %v404_v21, %v381_v20  ;;  %v382_v25 = vpop.f32.mrf.mxu1 }
  0xb8   :  { %v383_v27 = vadd.f32 %v382_v25, %v358_v24 }
  0xb9   :  { %v429_v26 = vadd.f32 %v428_v22, %v405_v23 }
  0xbb   :  { %440 = vst [vmem:[%s877_s3 + $0x10] sm:$0xff] %v429_v26 }
  0xbe   :  { %v406_v28 = vpop.f32.mrf.mxu2  ;;  %v361_v31 = vpop.f32.mrf.mxu0 }
  0xbf   :  { %v430_v29 = vpop.f32.mrf.mxu3  ;;  %v407_v30 = vadd.f32 %v406_v28, %v383_v27  ;;  %v385_v32 = vpop.f32.mrf.mxu1 }
  0xc0   :  { %v386_v34 = vadd.f32 %v385_v32, %v361_v31 }
  0xc1   :  { %v431_v33 = vadd.f32 %v430_v29, %v407_v30 }
  0xc3   :  { %441 = vst [vmem:[%s877_s3 + $0x18] sm:$0xff] %v431_v33 }
  0xc6   :  { %v409_v35 = vpop.f32.mrf.mxu2  ;;  %v363_v39 = vpop.f32.mrf.mxu0 }
  0xc7   :  { %v433_v36 = vpop.f32.mrf.mxu3  ;;  %v410_v37 = vadd.f32 %v409_v35, %v386_v34  ;;  %v387_v40 = vpop.f32.mrf.mxu1 }
  0xc8   :  { %v388_v41 = vadd.f32 %v387_v40, %v363_v39 }
  0xc9   :  { %v434_v38 = vadd.f32 %v433_v36, %v410_v37 }
  0xcb   :  { %442 = vst [vmem:[%s877_s3 + $0x20] sm:$0xff] %v434_v38 }
  0xce   :  { %v411_v42 = vpop.f32.mrf.mxu2 }
  0xcf   :  { %v412_v43 = vadd.f32 %v411_v42, %v388_v41  ;;  %v435_v44 = vpop.f32.mrf.mxu3 }
  0xd1   :  { %v436_v45 = vadd.f32 %v435_v44, %v412_v43 }
  0xd3   :  { %443 = vst [vmem:[%s877_s3 + $0x28] sm:$0xff] %v436_v45 }

// kernel: discriminator_forward.14
= control target key start
LH: loop header
LB: loop body
LE: loop exit
PB: predicated region body
PF: predicated region fallthrough
CT: control target
= control target key end

     0   :  { %v125_v0 = vmov 0   ;;  %v126_v7 = vmov 1   ;;  %s196_s1 = inlined_call_operand.vmem [shape: f32[48,2], index: 1, kind: input, shape index: {}]   ;;  %s197_s0 = inlined_call_operand.vmem [shape: f32[48,128], index: 0, kind: input, shape index: {}]   ;;  %s198_s2 = inlined_call_operand.vmem [shape: f32[48,128], index: 2, kind: output, shape index: {}]  }
   0x1   :  { %121 = vset.pattern.permute.xlu2 %v125_v0  ;;  %120 = vset.pattern.permute.xlu1 %v125_v0  ;;  %v21_v1 = vld [vmem:[%s196_s1 + $0x20] sm:$0xff]  ;;  %v19_v2 = vld [vmem:[%s196_s1 + $0x10] sm:$0xff]  ;;  %v22_v4 = vld [vmem:[%s196_s1 + $0x28] sm:$0xff] }
   0x2   :  { %v17_v3 = vld [vmem:[%s196_s1] sm:$0xff]  ;;  %119 = vset.pattern.permute.xlu0 %v125_v0  ;;  %45 = vperm.xlu2 %121, %v21_v1   ;;  %v20_v5 = vld [vmem:[%s196_s1 + $0x18] sm:$0xff]  ;;  %v18_v6 = vld [vmem:[%s196_s1 + $0x8] sm:$0xff] }
   0x3   :  { %35 = vperm.xlu1 %120, %v19_v2   ;;  %25 = vperm.xlu0 %119, %v17_v3   ;;  %v15_v11 = vld [vmem:[%s197_s0 + $0x20] sm:$0xff]  ;;  %v13_v13 = vld [vmem:[%s197_s0 + $0x10] sm:$0xff]  ;;  %v12_v26 = vld [vmem:[%s197_s0 + $0x8] sm:$0xff] }
   0x4   :  { %v11_v27 = vld [vmem:[%s197_s0] sm:$0xff]  ;;  %v14_v35 = vld [vmem:[%s197_s0 + $0x18] sm:$0xff]  ;;  %v16_v37 = vld [vmem:[%s197_s0 + $0x28] sm:$0xff] }
   0xa   :  { %50 = vperm.xlu2 %121, %v22_v4  }
   0xb   :  { %40 = vperm.xlu1 %120, %v20_v5   ;;  %30 = vperm.xlu0 %119, %v18_v6  }
  0x12   :  { %124 = vset.pattern.permute.xlu2 %v126_v7 }
  0x13   :  { %123 = vset.pattern.permute.xlu1 %v126_v7  ;;  %122 = vset.pattern.permute.xlu0 %v126_v7 }
  0x14   :  { %68 = vperm.xlu2 %124, %v19_v2   ;;  %64 = vperm.xlu1 %123, %v18_v6  }
  0x15   :  { %60 = vperm.xlu0 %122, %v17_v3  }
  0x1c   :  { %76 = vperm.xlu2 %124, %v21_v1   ;;  %72 = vperm.xlu1 %123, %v20_v5  }
  0x1d   :  { %80 = vperm.xlu0 %122, %v22_v4  }
  0x5c   :  { %v46_v8 = vpop.permute.xlu2 %45 }
  0x5d   :  { %v57_v12 = vmul.f32 %v46_v8, %v15_v11 }
  0x64   :  { %v51_v9 = vpop.permute.xlu2 %50 }
  0x65   :  { %v58_v41 = vmul.f32 %v51_v9, %v16_v37 }
  0x6e   :  { %v69_v10 = vpop.permute.xlu2 %68 }
  0x75   :  { %v36_v14 = vpop.permute.xlu1 %35  ;;  %v26_v15 = vpop.permute.xlu0 %25 }
  0x76   :  { %v55_v16 = vmul.f32 %v36_v14, %v13_v13  ;;  %v77_v17 = vpop.permute.xlu2 %76  ;;  %v53_v29 = vmul.f32 %v26_v15, %v11_v27 }
  0x77   :  { %v87_v18 = vadd.f32 %v77_v17, %v57_v12 }
  0x78   :  { %v85_v19 = vadd.f32 %v69_v10, %v55_v16 }
  0x79   :  { %vm93_vm0 = vcmp.ge.f32.partialorder %v87_v18, 0.0  ;;  %v99_v20 = vmul.f32 0.2, %v87_v18 }
  0x7a   :  { %vm91_vm1 = vcmp.ge.f32.partialorder %v85_v19, 0.0  ;;  %v97_v21 = vmul.f32 0.2, %v85_v19 }
  0x7b   :  { %v105_v22 = vsel %vm93_vm0, %v87_v18, %v99_v20 }
  0x7c   :  { %v103_v23 = vsel %vm91_vm1, %v85_v19, %v97_v21  ;;  %111 = vst [vmem:[%s198_s2 + $0x20] sm:$0xff] %v105_v22 }
  0x7d   :  { %109 = vst [vmem:[%s198_s2 + $0x10] sm:$0xff] %v103_v23  ;;  %v41_v24 = vpop.permute.xlu1 %40  ;;  %v31_v25 = vpop.permute.xlu0 %30 }
  0x7e   :  { %v54_v28 = vmul.f32 %v31_v25, %v12_v26  ;;  %v56_v40 = vmul.f32 %v41_v24, %v14_v35 }
  0x86   :  { %v65_v30 = vpop.permute.xlu1 %64 }
  0x87   :  { %v84_v31 = vadd.f32 %v65_v30, %v54_v28  ;;  %v61_v32 = vpop.permute.xlu0 %60 }
  0x88   :  { %v83_v33 = vadd.f32 %v61_v32, %v53_v29 }
  0x89   :  { %vm90_vm2 = vcmp.ge.f32.partialorder %v84_v31, 0.0  ;;  %v96_v34 = vmul.f32 0.2, %v84_v31 }
  0x8a   :  { %vm89_vm3 = vcmp.ge.f32.partialorder %v83_v33, 0.0  ;;  %v95_v36 = vmul.f32 0.2, %v83_v33 }
  0x8b   :  { %v102_v38 = vsel %vm90_vm2, %v84_v31, %v96_v34 }
  0x8c   :  { %108 = vst [vmem:[%s198_s2 + $0x8] sm:$0xff] %v102_v38  ;;  %v101_v39 = vsel %vm89_vm3, %v83_v33, %v95_v36 }
  0x8d   :  { %107 = vst [vmem:[%s198_s2] sm:$0xff] %v101_v39 }
  0x8e   :  { %v73_v42 = vpop.permute.xlu1 %72 }
  0x8f   :  { %v86_v43 = vadd.f32 %v73_v42, %v56_v40  ;;  %v81_v44 = vpop.permute.xlu0 %80 }
  0x90   :  { %v88_v45 = vadd.f32 %v81_v44, %v58_v41 }
  0x91   :  { %vm92_vm4 = vcmp.ge.f32.partialorder %v86_v43, 0.0  ;;  %v98_v46 = vmul.f32 0.2, %v86_v43 }
  0x92   :  { %vm94_vm5 = vcmp.ge.f32.partialorder %v88_v45, 0.0  ;;  %v100_v47 = vmul.f32 0.2, %v88_v45 }
  0x93   :  { %v104_v48 = vsel %vm92_vm4, %v86_v43, %v98_v46 }
  0x94   :  { %110 = vst [vmem:[%s198_s2 + $0x18] sm:$0xff] %v104_v48  ;;  %v106_v49 = vsel %vm94_vm5, %v88_v45, %v100_v47 }
  0x95   :  { %112 = vst [vmem:[%s198_s2 + $0x28] sm:$0xff] %v106_v49 }

// kernel: discriminator_forward.15
= control target key start
LH: loop header
LB: loop body
LE: loop exit
PB: predicated region body
PF: predicated region fallthrough
CT: control target
= control target key end

     0   :  { %v777_v29 = vmov 0   ;;  %s957_s1 = inlined_call_operand.vmem [shape: bf16[768,128], index: 1, kind: input, shape index: {}]   ;;  %s958_s0 = inlined_call_operand.vmem [shape: bf16[8,768], index: 0, kind: input, shape index: {}]   ;;  %s959_s2 = inlined_call_operand.vmem [shape: f32[8,1], index: 2, kind: input, shape index: {}]   ;;  %s960_s3 = inlined_call_operand.vmem [shape: f32[8,128], index: 3, kind: output, shape index: {}]  }
   0x1   :  { %v730_v0 = vld [vmem:[%s957_s1 + $0x38] sm:$0xff]  ;;  %v729_v2 = vld [vmem:[%s957_s1 + $0x30] sm:$0xff]  ;;  %v728_v8 = vld [vmem:[%s957_s1 + $0x28] sm:$0xff]  ;;  %772 = vset.pattern.permute.xlu0 %v777_v29 }
   0x2   :  { %v738_v1 = vld [vmem:[%s957_s1 + $0x78] sm:$0xff]  ;;  %428 = vmatpush.bf16.msra.mxu0 %v730_v0  ;;  %v737_v3 = vld [vmem:[%s957_s1 + $0x70] sm:$0xff]  ;;  %v736_v9 = vld [vmem:[%s957_s1 + $0x68] sm:$0xff] }
   0x3   :  { %441 = vmatpush.bf16.msra.mxu1 %v738_v1  ;;  %v746_v4 = vld [vmem:[%s957_s1 + $0xb8] sm:$0xff]  ;;  %v745_v6 = vld [vmem:[%s957_s1 + $0xb0] sm:$0xff]  ;;  %v744_v10 = vld [vmem:[%s957_s1 + $0xa8] sm:$0xff] }
   0x4   :  { %v754_v5 = vld [vmem:[%s957_s1 + $0xf8] sm:$0xff]  ;;  %454 = vmatpush.bf16.msra.mxu2 %v746_v4  ;;  %v753_v7 = vld [vmem:[%s957_s1 + $0xf0] sm:$0xff]  ;;  %v752_v11 = vld [vmem:[%s957_s1 + $0xe8] sm:$0xff] }
   0x5   :  { %467 = vmatpush.bf16.msra.mxu3 %v754_v5  ;;  %v727_v12 = vld [vmem:[%s957_s1 + $0x20] sm:$0xff]  ;;  %v726_v16 = vld [vmem:[%s957_s1 + $0x18] sm:$0xff]  ;;  %v725_v20 = vld [vmem:[%s957_s1 + $0x10] sm:$0xff] }
   0x6   :  { %429 = vmatpush.bf16.msra.mxu0 %v729_v2  ;;  %v735_v13 = vld [vmem:[%s957_s1 + $0x60] sm:$0xff]  ;;  %v734_v17 = vld [vmem:[%s957_s1 + $0x58] sm:$0xff]  ;;  %v733_v21 = vld [vmem:[%s957_s1 + $0x50] sm:$0xff] }
   0x7   :  { %442 = vmatpush.bf16.msra.mxu1 %v737_v3  ;;  %v743_v14 = vld [vmem:[%s957_s1 + $0xa0] sm:$0xff]  ;;  %v742_v18 = vld [vmem:[%s957_s1 + $0x98] sm:$0xff]  ;;  %v741_v22 = vld [vmem:[%s957_s1 + $0x90] sm:$0xff] }
   0x8   :  { %455 = vmatpush.bf16.msra.mxu2 %v745_v6  ;;  %v751_v15 = vld [vmem:[%s957_s1 + $0xe0] sm:$0xff]  ;;  %v750_v19 = vld [vmem:[%s957_s1 + $0xd8] sm:$0xff]  ;;  %v749_v23 = vld [vmem:[%s957_s1 + $0xd0] sm:$0xff] }
   0x9   :  { %468 = vmatpush.bf16.msra.mxu3 %v753_v7  ;;  %v724_v24 = vld [vmem:[%s957_s1 + $0x8] sm:$0xff]  ;;  %v14_v26 = vld [vmem:[%s958_s0] sm:$0xff]  ;;  %v762_v36 = vld [vmem:[%s957_s1 + $0x138] sm:$0xff] }
   0xa   :  { %430 = vmatpush.bf16.msra.mxu0 %v728_v8  ;;  %v732_v25 = vld [vmem:[%s957_s1 + $0x48] sm:$0xff]  ;;  %v113_v27 = vld [vmem:[%s959_s2] sm:$0xff]  ;;  %v122_v30 = vunpack.c.l.b16 %v14_v26  ;;  %v123_v32 = vunpack.c.h.b16 %v14_v26  ;;  %v770_v37 = vld [vmem:[%s957_s1 + $0x178] sm:$0xff] }
   0xb   :  { %443 = vmatpush.bf16.msra.mxu1 %v736_v9  ;;  %v740_v28 = vld [vmem:[%s957_s1 + $0x88] sm:$0xff]  ;;  %116 = vperm.xlu0 %772, %v113_v27   ;;  %v723_v34 = vld [vmem:[%s957_s1] sm:$0xff]  ;;  %v761_v44 = vld [vmem:[%s957_s1 + $0x130] sm:$0xff] }
   0xc   :  { %456 = vmatpush.bf16.msra.mxu2 %v744_v10  ;;  %v748_v31 = vld [vmem:[%s957_s1 + $0xc8] sm:$0xff]  ;;  %v731_v35 = vld [vmem:[%s957_s1 + $0x40] sm:$0xff]  ;;  %v128_v40 = vpack.c.b16 %v122_v30, %v122_v30  ;;  %v129_v41 = vpack.c.b16 %v123_v32, %v123_v32  ;;  %v769_v45 = vld [vmem:[%s957_s1 + $0x170] sm:$0xff] }
   0xd   :  { %469 = vmatpush.bf16.msra.mxu3 %v752_v11  ;;  %v15_v33 = vld [vmem:[%s958_s0 + $0x8] sm:$0xff]  ;;  %v739_v38 = vld [vmem:[%s957_s1 + $0x80] sm:$0xff]  ;;  %v758_v52 = vld [vmem:[%s957_s1 + $0x118] sm:$0xff] }
   0xe   :  { %431 = vmatpush.bf16.msra.mxu0 %v727_v12  ;;  %v124_v39 = vunpack.c.l.b16 %v15_v33  ;;  %v125_v42 = vunpack.c.h.b16 %v15_v33  ;;  %v747_v43 = vld [vmem:[%s957_s1 + $0xc0] sm:$0xff]  ;;  %v760_v48 = vld [vmem:[%s957_s1 + $0x128] sm:$0xff]  ;;  %v766_v53 = vld [vmem:[%s957_s1 + $0x158] sm:$0xff] }
   0xf   :  { %444 = vmatpush.bf16.msra.mxu1 %v735_v13  ;;  %v768_v49 = vld [vmem:[%s957_s1 + $0x168] sm:$0xff]  ;;  %v759_v50 = vld [vmem:[%s957_s1 + $0x120] sm:$0xff]  ;;  %v757_v54 = vld [vmem:[%s957_s1 + $0x110] sm:$0xff] }
  0x10   :  { %457 = vmatpush.bf16.msra.mxu2 %v743_v14  ;;  %v130_v46 = vpack.c.b16 %v124_v39, %v124_v39  ;;  %v131_v47 = vpack.c.b16 %v125_v42, %v125_v42  ;;  %v767_v51 = vld [vmem:[%s957_s1 + $0x160] sm:$0xff]  ;;  %v765_v55 = vld [vmem:[%s957_s1 + $0x150] sm:$0xff]  ;;  %v756_v56 = vld [vmem:[%s957_s1 + $0x108] sm:$0xff] }
  0x11   :  { %470 = vmatpush.bf16.msra.mxu3 %v751_v15  ;;  %v764_v57 = vld [vmem:[%s957_s1 + $0x148] sm:$0xff]  ;;  %v16_v58 = vld [vmem:[%s958_s0 + $0x10] sm:$0xff]  ;;  %v755_v61 = vld [vmem:[%s957_s1 + $0x100] sm:$0xff] }
  0x12   :  { %432 = vmatpush.bf16.msra.mxu0 %v726_v16  ;;  %v126_v59 = vunpack.c.l.b16 %v16_v58  ;;  %v127_v60 = vunpack.c.h.b16 %v16_v58  ;;  %v763_v62 = vld [vmem:[%s957_s1 + $0x140] sm:$0xff] }
  0x13   :  { %445 = vmatpush.bf16.msra.mxu1 %v734_v17 }
  0x14   :  { %458 = vmatpush.bf16.msra.mxu2 %v742_v18  ;;  %v132_v63 = vpack.c.b16 %v126_v59, %v126_v59  ;;  %v133_v0 = vpack.c.b16 %v127_v60, %v127_v60 }
  0x15   :  { %471 = vmatpush.bf16.msra.mxu3 %v750_v19 }
  0x16   :  { %433 = vmatpush.bf16.msra.mxu0 %v725_v20 }
  0x17   :  { %446 = vmatpush.bf16.msra.mxu1 %v733_v21 }
  0x18   :  { %459 = vmatpush.bf16.msra.mxu2 %v741_v22 }
  0x19   :  { %472 = vmatpush.bf16.msra.mxu3 %v749_v23 }
  0x1a   :  { %434 = vmatpush.bf16.msra.mxu0 %v724_v24 }
  0x1b   :  { %447 = vmatpush.bf16.msra.mxu1 %v732_v25 }
  0x1c   :  { %460 = vmatpush.bf16.msra.mxu2 %v740_v28 }
  0x1d   :  { %473 = vmatpush.bf16.msra.mxu3 %v748_v31 }
  0x1e   :  { %435 = vmatpush.bf16.msra.mxu0 %v723_v34 }
  0x1f   :  { %448 = vmatpush.bf16.msra.mxu1 %v731_v35 }
  0x20   :  { %461 = vmatpush.bf16.msra.mxu2 %v739_v38 }
  0x21   :  { %436 = vmatmul.bf16.vlgmr.msra.gmra.mxu0 %v128_v40  ;;  %474 = vmatpush.bf16.msra.mxu3 %v747_v43 }
  0x22   :  { %480 = vmatpush.bf16.msrb.mxu0 %v762_v36  ;;  %449 = vmatmul.bf16.vlgmr.msra.gmra.mxu1 %v129_v41 }
  0x23   :  { %493 = vmatpush.bf16.msrb.mxu1 %v770_v37  ;;  %462 = vmatmul.bf16.vlgmr.msra.gmra.mxu2 %v130_v46 }
  0x24   :  { %475 = vmatmul.bf16.vlgmr.msra.gmra.mxu3 %v131_v47 }
  0x26   :  { %481 = vmatpush.bf16.msrb.mxu0 %v761_v44 }
  0x27   :  { %494 = vmatpush.bf16.msrb.mxu1 %v769_v45 }
  0x2a   :  { %482 = vmatpush.bf16.msrb.mxu0 %v760_v48 }
  0x2b   :  { %495 = vmatpush.bf16.msrb.mxu1 %v768_v49 }
  0x2e   :  { %483 = vmatpush.bf16.msrb.mxu0 %v759_v50 }
  0x2f   :  { %496 = vmatpush.bf16.msrb.mxu1 %v767_v51 }
  0x32   :  { %484 = vmatpush.bf16.msrb.mxu0 %v758_v52 }
  0x33   :  { %497 = vmatpush.bf16.msrb.mxu1 %v766_v53 }
  0x36   :  { %485 = vmatpush.bf16.msrb.mxu0 %v757_v54 }
  0x37   :  { %498 = vmatpush.bf16.msrb.mxu1 %v765_v55 }
  0x3a   :  { %486 = vmatpush.bf16.msrb.mxu0 %v756_v56 }
  0x3b   :  { %499 = vmatpush.bf16.msrb.mxu1 %v764_v57 }
  0x3e   :  { %487 = vmatpush.bf16.msrb.mxu0 %v755_v61 }
  0x3f   :  { %500 = vmatpush.bf16.msrb.mxu1 %v763_v62 }
  0x41   :  { %488 = vmatmul.bf16.vlgmr.msrb.gmra.mxu0 %v132_v63 }
  0x42   :  { %501 = vmatmul.bf16.vlgmr.msrb.gmra.mxu1 %v133_v0 }
  0x7d   :  { %v117_v7 = vpop.permute.xlu0 %116 }
  0x9e   :  { %v437_v1 = vpop.f32.mrf.mxu0 }
  0x9f   :  { %v450_v2 = vpop.f32.mrf.mxu1  ;;  %v438_v8 = vadd.f32 %v437_v1, %v117_v7 }
  0xa1   :  { %v451_v11 = vadd.f32 %v450_v2, %v438_v8 }
  0xa6   :  { %v439_v3 = vpop.f32.mrf.mxu0  ;;  %v463_v5 = vpop.f32.mrf.mxu2 }
  0xa7   :  { %v452_v4 = vpop.f32.mrf.mxu1  ;;  %v476_v6 = vpop.f32.mrf.mxu3  ;;  %v464_v12 = vadd.f32 %v463_v5, %v451_v11 }
  0xa9   :  { %v477_v13 = vadd.f32 %v476_v6, %v464_v12 }
  0xae   :  { %v465_v9 = vpop.f32.mrf.mxu2 }
  0xaf   :  { %v478_v10 = vpop.f32.mrf.mxu3 }
  0xbe   :  { %v489_v14 = vpop.f32.mrf.mxu0 }
  0xbf   :  { %v502_v15 = vpop.f32.mrf.mxu1  ;;  %v490_v16 = vadd.f32 %v489_v14, %v477_v13 }
  0xc1   :  { %v503_v17 = vadd.f32 %v502_v15, %v490_v16 }
  0xc3   :  { %v722_v18 = vmul.f32 -1.442695, %v503_v17 }
  0xc5   :  { %773 = vpow2.f32 %v722_v18 }
  0xc6   :  { %v491_v19 = vpop.f32.mrf.mxu0 }
  0xc7   :  { %v504_v20 = vpop.f32.mrf.mxu1 }
  0xcb   :  { %v774_v21 = vpop.eup %773 }
  0xcc   :  { %v509_v22 = vadd.f32 1.0, %v774_v21 }
  0xce   :  { %775 = vrcp.f32 %v509_v22  ;;  %v521_v26 = vand.u32 2147483648, %v509_v22  ;;  %v519_v28 = vand.u32 2147483647, %v509_v22  ;;  %vm515_vm1 = vweird.f32 %v509_v22 }
  0xd0   :  { %v522_v30 = vor.u32 1.1754944e-38, %v521_v26  ;;  %vm520_vm3 = vcmp.eq.f32.partialorder %v519_v28, 8.507059e+37 }
  0xd4   :  { %v776_v23 = vpop.eup %775 }
  0xd5   :  { %v511_v24 = vmul.f32 %v776_v23, %v509_v22  ;;  %vm516_vm0 = vweird.f32 %v776_v23 }
  0xd6   :  { %vm517_vm2 = vmor %vm515_vm1, %vm516_vm0 }
  0xd7   :  { %v512_v25 = vsub.f32 1.0, %v511_v24 }
  0xd9   :  { %v513_v27 = vmul.f32 %v776_v23, %v512_v25 }
  0xdb   :  { %v514_v29 = vadd.f32 %v776_v23, %v513_v27 }
  0xdd   :  { %v518_v31 = vsel %vm517_vm2, %v776_v23, %v514_v29 }
  0xde   :  { %v523_v32 = vsel %vm520_vm3, %v522_v30, %v518_v31 }
  0xdf   :  { %525 = vst [vmem:[%s960_s3] sm:$0xff] %v523_v32 }

</bundles_post_ra>
